<compile_context>
chip_gen: v6e
topology: v6e:2x2x1
jax: 0.10.0
libtpu: 0.0.40
codegen_flags: <defaults>
</compile_context>

<pallas_src>
import functools

import jax
import jax.numpy as jnp
from jax import lax
from jax.experimental import pallas as pl
from jax.experimental.pallas import tpu as pltpu


MASK_VALUE = -1e30          # finite mask constant (first visited KV tile is always valid)


def _vmem_limit_bytes():
    # ~75% of physical per-core VMEM: ~48 MiB on v7x (64 MiB part), ~96 MiB on v5e/v6e
    # (128 MiB parts).  Conservative 48 MiB fallback if the query is unavailable.
    try:
        cap = pltpu.get_tpu_info().vmem_capacity_bytes
        return int(min(cap * 3 // 4, 112 * 1024 * 1024))
    except Exception:
        return 48 * 1024 * 1024


# ----------------------------- in-kernel helpers -----------------------------

def _layernorm(x, g, b, eps):
    # PyTorch nn.LayerNorm: biased variance over the last axis (f32).
    mean = jnp.mean(x, axis=-1, keepdims=True)
    var = jnp.mean(jnp.square(x - mean), axis=-1, keepdims=True)
    return (x - mean) * lax.rsqrt(var + eps) * g + b


def _gelu_new(x):
    # GPT-2 "gelu_new" (tanh approximation), f32.
    c = 0.7978845608028654  # sqrt(2/pi)
    return 0.5 * x * (1.0 + jnp.tanh(c * (x + 0.044715 * x * x * x)))


# ------------------ kernel 1: LN1 + QKV proj (head-major out) -----------------

def _ln1_qkv_kernel(x_ref, g_ref, b_ref, wqkv_ref, bqkv_ref,
                    q_ref, k_ref, v_ref, *, eps, num_heads, head_dim):
    H = num_heads * head_dim
    x = x_ref[...].astype(jnp.float32)                            # (bq, H)
    h = _layernorm(x, g_ref[...], b_ref[...], eps).astype(jnp.bfloat16)
    qkv = (jnp.dot(h, wqkv_ref[...], preferred_element_type=jnp.float32)
           + bqkv_ref[...]).astype(jnp.bfloat16)                  # (bq, 3H)
    # Head split done in-kernel (store-side layout plumbing, overlapped with the
    # pipeline) instead of wrapper-side XLA transposes that round-trip HBM.
    for hh in range(num_heads):
        lo = hh * head_dim
        q_ref[hh] = qkv[:, lo:lo + head_dim]
        k_ref[hh] = qkv[:, H + lo:H + lo + head_dim]
        v_ref[hh] = qkv[:, 2 * H + lo:2 * H + lo + head_dim]


# -------- kernel 2: flash causal attention on a lower-triangular grid --------

def _flash_attn_kernel(i_tab_ref, j_tab_ref, q_ref, k_ref, v_ref, o_ref,
                       m_sc, l_sc, acc_sc,
                       *, block_q, block_kv, num_heads, head_dim, scale):
    step = pl.program_id(0)
    i = i_tab_ref[step]          # query-tile index
    j = j_tab_ref[step]          # kv-tile index (only causally live tiles are visited)

    @pl.when(j == 0)
    def _():
        m_sc[...] = jnp.full(m_sc.shape, MASK_VALUE, dtype=m_sc.dtype)
        l_sc[...] = jnp.zeros(l_sc.shape, dtype=l_sc.dtype)
        acc_sc[...] = jnp.zeros(acc_sc.shape, dtype=acc_sc.dtype)

    q = q_ref[...]               # (heads, bq,  hd) bf16
    k = k_ref[...]               # (heads, bkv, hd) bf16
    v = v_ref[...]               # (heads, bkv, hd) bf16

    s = jnp.einsum("hqd,hkd->hqk", q, k,
                   preferred_element_type=jnp.float32) * scale    # (heads, bq, bkv) f32

    # Tile-local causal mask (only diagonal tiles actually mask anything).
    row = i * block_q + lax.broadcasted_iota(jnp.int32, (block_q, block_kv), 0)
    col = j * block_kv + lax.broadcasted_iota(jnp.int32, (block_q, block_kv), 1)
    s = jnp.where((row >= col)[None, :, :], s, MASK_VALUE)

    m_prev = m_sc[...]
    m_new = jnp.maximum(m_prev, s.max(axis=-1, keepdims=True))
    alpha = jnp.exp(m_prev - m_new)
    # TODO(synk): on v6e/v7x a bf16 exp here would roughly halve the EUP load; kept in
    #             f32 so numerics match the f32 reference on all generations (incl. v5e).
    p = jnp.exp(s - m_new)
    l_sc[...] = alpha * l_sc[...] + p.sum(axis=-1, keepdims=True)
    acc_sc[...] = alpha * acc_sc[...] + jnp.einsum(
        "hqk,hkd->hqd", p.astype(v.dtype), v, preferred_element_type=jnp.float32)
    m_sc[...] = m_new

    # Finalize on the last causally valid KV tile of this query row: normalize, merge
    # heads back onto the lane axis, and emit one lane-dense (block_q, H) store.
    @pl.when((j + 1) * block_kv >= (i + 1) * block_q)
    def _():
        inv_l = pl.reciprocal(l_sc[...], approx=True)
        o = acc_sc[...] * inv_l                                    # (heads, bq, hd) f32
        merged = jnp.concatenate([o[hh] for hh in range(num_heads)], axis=-1)
        o_ref[...] = merged.astype(o_ref.dtype)                    # (bq, H)


# --- kernel 3: attn out-proj + residual + LN2 + MLP (inner-tiled) + residual ---

def _proj_mlp_kernel(x_ref, attn_ref, wo_ref, bo_ref, ln2_g_ref, ln2_b_ref,
                     wfc_ref, bfc_ref, wpr_ref, bpr_ref, out_ref,
                     x1_sc, h2_sc, acc_sc, *, eps):
    t = pl.program_id(1)         # MLP inner-dim tile ("arbitrary" reduction axis)

    @pl.when(t == 0)
    def _():
        x = x_ref[...].astype(jnp.float32)                         # (bq, H)
        a = jnp.dot(attn_ref[...], wo_ref[...],
                    preferred_element_type=jnp.float32) + bo_ref[...]
        x1 = x + a                                                 # residual 1 (f32)
        x1_sc[...] = x1
        h2_sc[...] = _layernorm(x1, ln2_g_ref[...], ln2_b_ref[...],
                                eps).astype(jnp.bfloat16)
        acc_sc[...] = jnp.zeros(acc_sc.shape, dtype=acc_sc.dtype)

    # One (H, block_inner) slab of c_fc and (block_inner, H) slab of c_proj per step.
    # GELU is elementwise over the inner dim, so tiling it is exact.
    f = jnp.dot(h2_sc[...], wfc_ref[...],
                preferred_element_type=jnp.float32) + bfc_ref[...]
    f = _gelu_new(f).astype(jnp.bfloat16)
    acc_sc[...] += jnp.dot(f, wpr_ref[...], preferred_element_type=jnp.float32)

    @pl.when(t == pl.num_programs(1) - 1)
    def _():
        out_ref[...] = (x1_sc[...] + acc_sc[...] + bpr_ref[...]).astype(out_ref.dtype)


# --------------------------------- wrapper ------------------------------------

def gpt2_block(x, params, *, num_heads, eps=1e-5,
               block_q=128, block_kv=128, block_inner=512):
    S, H = x.shape
    assert H % num_heads == 0
    head_dim = H // num_heads
    inner = params["wfc"].shape[1]

    block_q = min(block_q, S)
    block_kv = min(block_kv, S)
    block_inner = min(block_inner, inner)
    assert S % block_q == 0 and S % block_kv == 0, "S must be divisible by block sizes"
    assert inner % block_inner == 0, "inner dim must be divisible by block_inner"
    nq = S // block_q
    n_inner = inner // block_inner

    bf16, f32 = jnp.bfloat16, jnp.float32
    # bf16 weights: halves weight DMA bytes + VMEM residency; f32 accumulation in-kernel.
    wqkv = params["wqkv"].astype(bf16)
    wo = params["wo"].astype(bf16)
    wfc = params["wfc"].astype(bf16)
    wpr = params["wpr"].astype(bf16)
    ln1_g, ln1_b = params["ln1_g"].astype(f32), params["ln1_b"].astype(f32)
    ln2_g, ln2_b = params["ln2_g"].astype(f32), params["ln2_b"].astype(f32)
    bqkv, bo = params["bqkv"].astype(f32), params["bo"].astype(f32)
    bfc, bpr = params["bfc"].astype(f32), params["bpr"].astype(f32)

    vmem_limit = _vmem_limit_bytes()

    # ---------------- kernel 1: LN1 + QKV (head-major outputs) ----------------
    qkv_cost = pl.CostEstimate(
        flops=2 * S * H * 3 * H, transcendentals=S,
        bytes_accessed=S * H * 4 + H * 3 * H * 2 + 3 * S * H * 2)
    q, k, v = pl.pallas_call(
        functools.partial(_ln1_qkv_kernel, eps=eps,
                          num_heads=num_heads, head_dim=head_dim),
        grid=(nq,),
        in_specs=[
            pl.BlockSpec((block_q, H), lambda i: (i, 0)),
            pl.BlockSpec((1, H), lambda i: (0, 0)),
            pl.BlockSpec((1, H), lambda i: (0, 0)),
            pl.BlockSpec((H, 3 * H), lambda i: (0, 0)),      # resident weights
            pl.BlockSpec((1, 3 * H), lambda i: (0, 0)),
        ],
        out_specs=[pl.BlockSpec((num_heads, block_q, head_dim),
                                lambda i: (0, i, 0))] * 3,
        out_shape=[jax.ShapeDtypeStruct((num_heads, S, head_dim), bf16)] * 3,
        compiler_params=pltpu.CompilerParams(
            dimension_semantics=("parallel",), vmem_limit_bytes=vmem_limit),
        cost_estimate=qkv_cost,
    )(x, ln1_g, ln1_b, wqkv, bqkv)

    # ------- kernel 2: flash causal attention on a lower-triangular grid -------
    # Flattened (i, j) step tables: only causally live KV tiles are visited, so dead
    # tiles cost neither DMA nor a grid step.
    steps = [(i, j) for i in range(nq)
             for j in range(-(-((i + 1) * block_q) // block_kv))]
    i_tab = jnp.asarray([p_[0] for p_ in steps], dtype=jnp.int32)
    j_tab = jnp.asarray([p_[1] for p_ in steps], dtype=jnp.int32)
    n_steps = len(steps)

    scale = 1.0 / (head_dim ** 0.5)
    attn_cost = pl.CostEstimate(
        flops=4 * num_heads * n_steps * block_q * block_kv * head_dim,
        transcendentals=2 * num_heads * n_steps * block_q * block_kv,
        bytes_accessed=2 * S * H * 2
        + 2 * n_steps * num_heads * block_kv * head_dim * 2)
    attn = pl.pallas_call(
        functools.partial(_flash_attn_kernel, block_q=block_q, block_kv=block_kv,
                          num_heads=num_heads, head_dim=head_dim, scale=scale),
        grid_spec=pltpu.PrefetchScalarGridSpec(
            num_scalar_prefetch=2,
            grid=(n_steps,),
            in_specs=[
                pl.BlockSpec((num_heads, block_q, head_dim),
                             lambda s, it, jt: (0, it[s], 0)),
                pl.BlockSpec((num_heads, block_kv, head_dim),
                             lambda s, it, jt: (0, jt[s], 0)),
                pl.BlockSpec((num_heads, block_kv, head_dim),
                             lambda s, it, jt: (0, jt[s], 0)),
            ],
            out_specs=pl.BlockSpec((block_q, H), lambda s, it, jt: (it[s], 0)),
            scratch_shapes=[
                pltpu.VMEM((num_heads, block_q, 1), jnp.float32),          # running max
                pltpu.VMEM((num_heads, block_q, 1), jnp.float32),          # running sum
                pltpu.VMEM((num_heads, block_q, head_dim), jnp.float32),   # accumulator
            ]),
        out_shape=jax.ShapeDtypeStruct((S, H), bf16),
        compiler_params=pltpu.CompilerParams(
            dimension_semantics=("arbitrary",), vmem_limit_bytes=vmem_limit),
        cost_estimate=attn_cost,
    )(i_tab, j_tab, q, k, v)

    # --- kernel 3: out-proj + residual + LN2 + MLP (inner-dim streamed) + residual ---
    mlp_cost = pl.CostEstimate(
        flops=2 * S * H * H + 4 * S * H * inner,
        transcendentals=S * inner,
        bytes_accessed=2 * S * H * 4 + S * H * 2 + (H * H + 2 * H * inner) * 2)
    out = pl.pallas_call(
        functools.partial(_proj_mlp_kernel, eps=eps),
        grid=(nq, n_inner),
        in_specs=[
            pl.BlockSpec((block_q, H), lambda i, t: (i, 0)),        # x (residual)
            pl.BlockSpec((block_q, H), lambda i, t: (i, 0)),        # attention output
            pl.BlockSpec((H, H), lambda i, t: (0, 0)),              # wo (resident)
            pl.BlockSpec((1, H), lambda i, t: (0, 0)),              # bo
            pl.BlockSpec((1, H), lambda i, t: (0, 0)),              # ln2 gamma
            pl.BlockSpec((1, H), lambda i, t: (0, 0)),              # ln2 beta
            pl.BlockSpec((H, block_inner), lambda i, t: (0, t)),    # wfc column slab
            pl.BlockSpec((1, block_inner), lambda i, t: (0, t)),    # bfc slab
            pl.BlockSpec((block_inner, H), lambda i, t: (t, 0)),    # wpr row slab
            pl.BlockSpec((1, H), lambda i, t: (0, 0)),              # bpr
        ],
        out_specs=pl.BlockSpec((block_q, H), lambda i, t: (i, 0)),
        out_shape=jax.ShapeDtypeStruct((S, H), x.dtype),
        scratch_shapes=[
            pltpu.VMEM((block_q, H), jnp.float32),     # residual-1 (x + attn out-proj)
            pltpu.VMEM((block_q, H), jnp.bfloat16),    # LN2 output
            pltpu.VMEM((block_q, H), jnp.float32),     # MLP c_proj accumulator
        ],
        compiler_params=pltpu.CompilerParams(
            dimension_semantics=("parallel", "arbitrary"),
            vmem_limit_bytes=vmem_limit),
        cost_estimate=mlp_cost,
    )(x, attn, wo, bo, ln2_g, ln2_b, wfc, bfc, wpr, bpr)

    return out


# ------------------------------ pure-JAX reference ----------------------------
# Mirrors the kernel's compute dtypes (bf16 matmul operands, f32 accumulation).

def gpt2_block_ref(x, p, *, num_heads, eps=1e-5):
    S, H = x.shape
    hd = H // num_heads
    bf16 = jnp.bfloat16
    xf = x.astype(jnp.float32)

    h = _layernorm(xf, p["ln1_g"], p["ln1_b"], eps).astype(bf16)
    qkv = jnp.dot(h, p["wqkv"].astype(bf16),
                  preferred_element_type=jnp.float32) + p["bqkv"]
    q = qkv[:, :H].astype(bf16)
    k = qkv[:, H:2 * H].astype(bf16)
    v = qkv[:, 2 * H:].astype(bf16)
    qh = q.reshape(S, num_heads, hd).transpose(1, 0, 2)
    kh = k.reshape(S, num_heads, hd).transpose(1, 0, 2)
    vh = v.reshape(S, num_heads, hd).transpose(1, 0, 2)

    s = jnp.einsum("hqd,hkd->hqk", qh, kh,
                   preferred_element_type=jnp.float32) * (hd ** -0.5)
    mask = jnp.tril(jnp.ones((S, S), bool))
    s = jnp.where(mask[None], s, MASK_VALUE)
    s = s - s.max(-1, keepdims=True)
    pm = jnp.exp(s)
    pm = pm / pm.sum(-1, keepdims=True)
    a = jnp.einsum("hqk,hkd->hqd", pm.astype(bf16), vh,
                   preferred_element_type=jnp.float32)
    a = a.transpose(1, 0, 2).reshape(S, H).astype(bf16)
    a = jnp.dot(a, p["wo"].astype(bf16),
                preferred_element_type=jnp.float32) + p["bo"]
    x1 = xf + a

    h2 = _layernorm(x1, p["ln2_g"], p["ln2_b"], eps).astype(bf16)
    f = jnp.dot(h2, p["wfc"].astype(bf16),
                preferred_element_type=jnp.float32) + p["bfc"]
    f = _gelu_new(f).astype(bf16)
    f = jnp.dot(f, p["wpr"].astype(bf16),
                preferred_element_type=jnp.float32) + p["bpr"]
    return x1 + f


# ----------------------------------- main --------------------------------------

if __name__ == "__main__":
    S, H, NUM_HEADS = 256, 64, 4       # seq=256, hidden=64, 4 heads (head_dim=16)
    INNER = 4 * H                      # GPT-2 default n_inner
    EPS = 1e-5
    BLOCK_Q = BLOCK_KV = 128           # -> 3-step lower-triangular attention grid
    BLOCK_INNER = 128                  # -> 2-step MLP inner-dim accumulation

    keys = jax.random.split(jax.random.PRNGKey(0), 13)

    def nrm(k, shape, scale=0.02):
        return (scale * jax.random.normal(k, shape)).astype(jnp.float32)

    params = {
        "ln1_g": 1.0 + nrm(keys[0], (1, H), 0.1),
        "ln1_b": nrm(keys[1], (1, H), 0.1),
        "wqkv":  nrm(keys[2], (H, 3 * H)),
        "bqkv":  nrm(keys[3], (1, 3 * H)),
        "wo":    nrm(keys[4], (H, H)),
        "bo":    nrm(keys[5], (1, H)),
        "ln2_g": 1.0 + nrm(keys[6], (1, H), 0.1),
        "ln2_b": nrm(keys[7], (1, H), 0.1),
        "wfc":   nrm(keys[8], (H, INNER)),
        "bfc":   nrm(keys[9], (1, INNER)),
        "wpr":   nrm(keys[10], (INNER, H)),
        "bpr":   nrm(keys[11], (1, H)),
    }
    x = jax.random.normal(keys[12], (S, H), dtype=jnp.float32)

    out = gpt2_block(x, params, num_heads=NUM_HEADS, eps=EPS,
                     block_q=BLOCK_Q, block_kv=BLOCK_KV, block_inner=BLOCK_INNER)
    out = jax.block_until_ready(out)

    ref = gpt2_block_ref(x, params, num_heads=NUM_HEADS, eps=EPS)
    assert out.shape == (S, H)
    err = jnp.max(jnp.abs(out - ref))
    assert jnp.allclose(out, ref, rtol=1e-2, atol=1e-2), f"max abs err {err}"

    print("KERNEL_OK")
</pallas_src>

<mosaic_0001>
module attributes {stable_mosaic.version = 11 : i64} {
  func.func @_ln1_qkv_kernel(%arg0: i32, %arg1: memref<128x64xf32, #tpu.memory_space<vmem>>, %arg2: memref<1x64xf32, #tpu.memory_space<vmem>>, %arg3: memref<1x64xf32, #tpu.memory_space<vmem>>, %arg4: memref<64x192xbf16, #tpu.memory_space<vmem>>, %arg5: memref<1x192xf32, #tpu.memory_space<vmem>>, %arg6: memref<4x128x16xbf16, #tpu.memory_space<vmem>>, %arg7: memref<4x128x16xbf16, #tpu.memory_space<vmem>>, %arg8: memref<4x128x16xbf16, #tpu.memory_space<vmem>>) attributes {dimension_semantics = [#tpu.dimension_semantics<parallel>], iteration_bounds = array<i64: 2>, scalar_prefetch = 0 : i64, scratch_operands = 0 : i64, tpu.core_type = #tpu.core_type<tc>, window_params = [{transform_indices = @transform_0, window_bounds = array<i64: 128, 64>}, {pipeline_mode = #tpu.pipeline_mode<synchronous>, transform_indices = @transform_1, window_bounds = array<i64: 1, 64>}, {pipeline_mode = #tpu.pipeline_mode<synchronous>, transform_indices = @transform_2, window_bounds = array<i64: 1, 64>}, {pipeline_mode = #tpu.pipeline_mode<synchronous>, transform_indices = @transform_3, window_bounds = array<i64: 64, 192>}, {pipeline_mode = #tpu.pipeline_mode<synchronous>, transform_indices = @transform_4, window_bounds = array<i64: 1, 192>}, {transform_indices = @transform_5, window_bounds = array<i64: 4, 128, 16>}, {transform_indices = @transform_6, window_bounds = array<i64: 4, 128, 16>}, {transform_indices = @transform_7, window_bounds = array<i64: 4, 128, 16>}]} {
    %c0 = arith.constant 0 : index
    %c0_0 = arith.constant 0 : index
    %0 = vector.load %arg1[%c0, %c0_0] : memref<128x64xf32, #tpu.memory_space<vmem>>, vector<128x64xf32>
    %c0_1 = arith.constant 0 : index
    %c0_2 = arith.constant 0 : index
    %1 = vector.load %arg2[%c0_1, %c0_2] : memref<1x64xf32, #tpu.memory_space<vmem>>, vector<1x64xf32>
    %c0_3 = arith.constant 0 : index
    %c0_4 = arith.constant 0 : index
    %2 = vector.load %arg3[%c0_3, %c0_4] : memref<1x64xf32, #tpu.memory_space<vmem>>, vector<1x64xf32>
    %cst = arith.constant dense<0.000000e+00> : vector<128xf32>
    %3 = vector.multi_reduction <add>, %0, %cst [1] : vector<128x64xf32> to vector<128xf32>
    %4 = vector.shape_cast %3 : vector<128xf32> to vector<128x1xf32>
    %cst_5 = arith.constant 6.400000e+01 : f32
    %5 = vector.broadcast %cst_5 : f32 to vector<128x1xf32>
    %6 = arith.divf %4, %5 : vector<128x1xf32>
    %7 = vector.broadcast %6 : vector<128x1xf32> to vector<128x64xf32>
    %8 = arith.subf %0, %7 : vector<128x64xf32>
    %9 = arith.mulf %8, %8 : vector<128x64xf32>
    %cst_6 = arith.constant dense<0.000000e+00> : vector<128xf32>
    %10 = vector.multi_reduction <add>, %9, %cst_6 [1] : vector<128x64xf32> to vector<128xf32>
    %11 = vector.shape_cast %10 : vector<128xf32> to vector<128x1xf32>
    %cst_7 = arith.constant 6.400000e+01 : f32
    %12 = vector.broadcast %cst_7 : f32 to vector<128x1xf32>
    %13 = arith.divf %11, %12 : vector<128x1xf32>
    %14 = vector.broadcast %6 : vector<128x1xf32> to vector<128x64xf32>
    %15 = arith.subf %0, %14 : vector<128x64xf32>
    %cst_8 = arith.constant 9.99999974E-6 : f32
    %16 = vector.broadcast %cst_8 : f32 to vector<128x1xf32>
    %17 = arith.addf %13, %16 : vector<128x1xf32>
    %18 = math.rsqrt %17 : vector<128x1xf32>
    %19 = vector.broadcast %18 : vector<128x1xf32> to vector<128x64xf32>
    %20 = arith.mulf %15, %19 : vector<128x64xf32>
    %21 = vector.broadcast %1 : vector<1x64xf32> to vector<128x64xf32>
    %22 = arith.mulf %20, %21 : vector<128x64xf32>
    %23 = vector.broadcast %2 : vector<1x64xf32> to vector<128x64xf32>
    %24 = arith.addf %22, %23 : vector<128x64xf32>
    %25 = arith.truncf %24 : vector<128x64xf32> to vector<128x64xbf16>
    %c0_9 = arith.constant 0 : index
    %c0_10 = arith.constant 0 : index
    %26 = vector.load %arg4[%c0_9, %c0_10] : memref<64x192xbf16, #tpu.memory_space<vmem>>, vector<64x192xbf16>
    %cst_11 = arith.constant dense<0.000000e+00> : vector<128x192xf32>
    %27 = tpu.matmul %25, %26, %cst_11 {dimension_numbers = #tpu.dot_dimension_numbers<[1], [0], [0], [1], [0, 0, 1, 1], [], []>} : vector<128x64xbf16>, vector<64x192xbf16>, vector<128x192xf32> -> vector<128x192xf32>
    %c0_12 = arith.constant 0 : index
    %c0_13 = arith.constant 0 : index
    %28 = vector.load %arg5[%c0_12, %c0_13] : memref<1x192xf32, #tpu.memory_space<vmem>>, vector<1x192xf32>
    %29 = vector.broadcast %28 : vector<1x192xf32> to vector<128x192xf32>
    %30 = arith.addf %27, %29 : vector<128x192xf32>
    %31 = arith.truncf %30 : vector<128x192xf32> to vector<128x192xbf16>
    %32 = vector.extract_strided_slice %31 {offsets = [0, 0], sizes = [128, 16], strides = [1, 1]} : vector<128x192xbf16> to vector<128x16xbf16>
    %c0_14 = arith.constant 0 : index
    %c0_15 = arith.constant 0 : index
    %c0_16 = arith.constant 0 : index
    %33 = vector.load %arg6[%c0_14, %c0_15, %c0_16] : memref<4x128x16xbf16, #tpu.memory_space<vmem>>, vector<1x128x16xbf16>
    %34 = vector.shape_cast %33 : vector<1x128x16xbf16> to vector<128x16xbf16>
    %35 = vector.shape_cast %32 : vector<128x16xbf16> to vector<1x128x16xbf16>
    tpu.vector_store %arg6[%c0_14, %c0_15, %c0_16], %35 {strides = array<i32>} : memref<4x128x16xbf16, #tpu.memory_space<vmem>>, vector<1x128x16xbf16>,
    %36 = vector.extract_strided_slice %31 {offsets = [0, 64], sizes = [128, 16], strides = [1, 1]} : vector<128x192xbf16> to vector<128x16xbf16>
    %c0_17 = arith.constant 0 : index
    %c0_18 = arith.constant 0 : index
    %c0_19 = arith.constant 0 : index
    %37 = vector.load %arg7[%c0_17, %c0_18, %c0_19] : memref<4x128x16xbf16, #tpu.memory_space<vmem>>, vector<1x128x16xbf16>
    %38 = vector.shape_cast %37 : vector<1x128x16xbf16> to vector<128x16xbf16>
    %39 = vector.shape_cast %36 : vector<128x16xbf16> to vector<1x128x16xbf16>
    tpu.vector_store %arg7[%c0_17, %c0_18, %c0_19], %39 {strides = array<i32>} : memref<4x128x16xbf16, #tpu.memory_space<vmem>>, vector<1x128x16xbf16>,
    %40 = vector.extract_strided_slice %31 {offsets = [0, 128], sizes = [128, 16], strides = [1, 1]} : vector<128x192xbf16> to vector<128x16xbf16>
    %c0_20 = arith.constant 0 : index
    %c0_21 = arith.constant 0 : index
    %c0_22 = arith.constant 0 : index
    %41 = vector.load %arg8[%c0_20, %c0_21, %c0_22] : memref<4x128x16xbf16, #tpu.memory_space<vmem>>, vector<1x128x16xbf16>
    %42 = vector.shape_cast %41 : vector<1x128x16xbf16> to vector<128x16xbf16>
    %43 = vector.shape_cast %40 : vector<128x16xbf16> to vector<1x128x16xbf16>
    tpu.vector_store %arg8[%c0_20, %c0_21, %c0_22], %43 {strides = array<i32>} : memref<4x128x16xbf16, #tpu.memory_space<vmem>>, vector<1x128x16xbf16>,
    %44 = vector.extract_strided_slice %31 {offsets = [0, 16], sizes = [128, 16], strides = [1, 1]} : vector<128x192xbf16> to vector<128x16xbf16>
    %c1 = arith.constant 1 : index
    %c0_23 = arith.constant 0 : index
    %c0_24 = arith.constant 0 : index
    %45 = vector.load %arg6[%c1, %c0_23, %c0_24] : memref<4x128x16xbf16, #tpu.memory_space<vmem>>, vector<1x128x16xbf16>
    %46 = vector.shape_cast %45 : vector<1x128x16xbf16> to vector<128x16xbf16>
    %47 = vector.shape_cast %44 : vector<128x16xbf16> to vector<1x128x16xbf16>
    tpu.vector_store %arg6[%c1, %c0_23, %c0_24], %47 {strides = array<i32>} : memref<4x128x16xbf16, #tpu.memory_space<vmem>>, vector<1x128x16xbf16>,
    %48 = vector.extract_strided_slice %31 {offsets = [0, 80], sizes = [128, 16], strides = [1, 1]} : vector<128x192xbf16> to vector<128x16xbf16>
    %c1_25 = arith.constant 1 : index
    %c0_26 = arith.constant 0 : index
    %c0_27 = arith.constant 0 : index
    %49 = vector.load %arg7[%c1_25, %c0_26, %c0_27] : memref<4x128x16xbf16, #tpu.memory_space<vmem>>, vector<1x128x16xbf16>
    %50 = vector.shape_cast %49 : vector<1x128x16xbf16> to vector<128x16xbf16>
    %51 = vector.shape_cast %48 : vector<128x16xbf16> to vector<1x128x16xbf16>
    tpu.vector_store %arg7[%c1_25, %c0_26, %c0_27], %51 {strides = array<i32>} : memref<4x128x16xbf16, #tpu.memory_space<vmem>>, vector<1x128x16xbf16>,
    %52 = vector.extract_strided_slice %31 {offsets = [0, 144], sizes = [128, 16], strides = [1, 1]} : vector<128x192xbf16> to vector<128x16xbf16>
    %c1_28 = arith.constant 1 : index
    %c0_29 = arith.constant 0 : index
    %c0_30 = arith.constant 0 : index
    %53 = vector.load %arg8[%c1_28, %c0_29, %c0_30] : memref<4x128x16xbf16, #tpu.memory_space<vmem>>, vector<1x128x16xbf16>
    %54 = vector.shape_cast %53 : vector<1x128x16xbf16> to vector<128x16xbf16>
    %55 = vector.shape_cast %52 : vector<128x16xbf16> to vector<1x128x16xbf16>
    tpu.vector_store %arg8[%c1_28, %c0_29, %c0_30], %55 {strides = array<i32>} : memref<4x128x16xbf16, #tpu.memory_space<vmem>>, vector<1x128x16xbf16>,
    %56 = vector.extract_strided_slice %31 {offsets = [0, 32], sizes = [128, 16], strides = [1, 1]} : vector<128x192xbf16> to vector<128x16xbf16>
    %c2 = arith.constant 2 : index
    %c0_31 = arith.constant 0 : index
    %c0_32 = arith.constant 0 : index
    %57 = vector.load %arg6[%c2, %c0_31, %c0_32] : memref<4x128x16xbf16, #tpu.memory_space<vmem>>, vector<1x128x16xbf16>
    %58 = vector.shape_cast %57 : vector<1x128x16xbf16> to vector<128x16xbf16>
    %59 = vector.shape_cast %56 : vector<128x16xbf16> to vector<1x128x16xbf16>
    tpu.vector_store %arg6[%c2, %c0_31, %c0_32], %59 {strides = array<i32>} : memref<4x128x16xbf16, #tpu.memory_space<vmem>>, vector<1x128x16xbf16>,
    %60 = vector.extract_strided_slice %31 {offsets = [0, 96], sizes = [128, 16], strides = [1, 1]} : vector<128x192xbf16> to vector<128x16xbf16>
    %c2_33 = arith.constant 2 : index
    %c0_34 = arith.constant 0 : index
    %c0_35 = arith.constant 0 : index
    %61 = vector.load %arg7[%c2_33, %c0_34, %c0_35] : memref<4x128x16xbf16, #tpu.memory_space<vmem>>, vector<1x128x16xbf16>
    %62 = vector.shape_cast %61 : vector<1x128x16xbf16> to vector<128x16xbf16>
    %63 = vector.shape_cast %60 : vector<128x16xbf16> to vector<1x128x16xbf16>
    tpu.vector_store %arg7[%c2_33, %c0_34, %c0_35], %63 {strides = array<i32>} : memref<4x128x16xbf16, #tpu.memory_space<vmem>>, vector<1x128x16xbf16>,
    %64 = vector.extract_strided_slice %31 {offsets = [0, 160], sizes = [128, 16], strides = [1, 1]} : vector<128x192xbf16> to vector<128x16xbf16>
    %c2_36 = arith.constant 2 : index
    %c0_37 = arith.constant 0 : index
    %c0_38 = arith.constant 0 : index
    %65 = vector.load %arg8[%c2_36, %c0_37, %c0_38] : memref<4x128x16xbf16, #tpu.memory_space<vmem>>, vector<1x128x16xbf16>
    %66 = vector.shape_cast %65 : vector<1x128x16xbf16> to vector<128x16xbf16>
    %67 = vector.shape_cast %64 : vector<128x16xbf16> to vector<1x128x16xbf16>
    tpu.vector_store %arg8[%c2_36, %c0_37, %c0_38], %67 {strides = array<i32>} : memref<4x128x16xbf16, #tpu.memory_space<vmem>>, vector<1x128x16xbf16>,
    %68 = vector.extract_strided_slice %31 {offsets = [0, 48], sizes = [128, 16], strides = [1, 1]} : vector<128x192xbf16> to vector<128x16xbf16>
    %c3 = arith.constant 3 : index
    %c0_39 = arith.constant 0 : index
    %c0_40 = arith.constant 0 : index
    %69 = vector.load %arg6[%c3, %c0_39, %c0_40] : memref<4x128x16xbf16, #tpu.memory_space<vmem>>, vector<1x128x16xbf16>
    %70 = vector.shape_cast %69 : vector<1x128x16xbf16> to vector<128x16xbf16>
    %71 = vector.shape_cast %68 : vector<128x16xbf16> to vector<1x128x16xbf16>
    tpu.vector_store %arg6[%c3, %c0_39, %c0_40], %71 {strides = array<i32>} : memref<4x128x16xbf16, #tpu.memory_space<vmem>>, vector<1x128x16xbf16>,
    %72 = vector.extract_strided_slice %31 {offsets = [0, 112], sizes = [128, 16], strides = [1, 1]} : vector<128x192xbf16> to vector<128x16xbf16>
    %c3_41 = arith.constant 3 : index
    %c0_42 = arith.constant 0 : index
    %c0_43 = arith.constant 0 : index
    %73 = vector.load %arg7[%c3_41, %c0_42, %c0_43] : memref<4x128x16xbf16, #tpu.memory_space<vmem>>, vector<1x128x16xbf16>
    %74 = vector.shape_cast %73 : vector<1x128x16xbf16> to vector<128x16xbf16>
    %75 = vector.shape_cast %72 : vector<128x16xbf16> to vector<1x128x16xbf16>
    tpu.vector_store %arg7[%c3_41, %c0_42, %c0_43], %75 {strides = array<i32>} : memref<4x128x16xbf16, #tpu.memory_space<vmem>>, vector<1x128x16xbf16>,
    %76 = vector.extract_strided_slice %31 {offsets = [0, 176], sizes = [128, 16], strides = [1, 1]} : vector<128x192xbf16> to vector<128x16xbf16>
    %c3_44 = arith.constant 3 : index
    %c0_45 = arith.constant 0 : index
    %c0_46 = arith.constant 0 : index
    %77 = vector.load %arg8[%c3_44, %c0_45, %c0_46] : memref<4x128x16xbf16, #tpu.memory_space<vmem>>, vector<1x128x16xbf16>
    %78 = vector.shape_cast %77 : vector<1x128x16xbf16> to vector<128x16xbf16>
    %79 = vector.shape_cast %76 : vector<128x16xbf16> to vector<1x128x16xbf16>
    tpu.vector_store %arg8[%c3_44, %c0_45, %c0_46], %79 {strides = array<i32>} : memref<4x128x16xbf16, #tpu.memory_space<vmem>>, vector<1x128x16xbf16>,
    return
  }
  func.func @transform_0(%arg0: i32) -> (i32, i32) {
    %c0_i32 = arith.constant 0 : i32
    %c0_i32_0 = arith.constant 0 : i32
    return %arg0, %c0_i32 : i32, i32
  }
  func.func @transform_1(%arg0: i32) -> (i32, i32) {
    %c0_i32 = arith.constant 0 : i32
    %c0_i32_0 = arith.constant 0 : i32
    %c0_i32_1 = arith.constant 0 : i32
    return %c0_i32, %c0_i32_0 : i32, i32
  }
  func.func @transform_2(%arg0: i32) -> (i32, i32) {
    %c0_i32 = arith.constant 0 : i32
    %c0_i32_0 = arith.constant 0 : i32
    %c0_i32_1 = arith.constant 0 : i32
    return %c0_i32, %c0_i32_0 : i32, i32
  }
  func.func @transform_3(%arg0: i32) -> (i32, i32) {
    %c0_i32 = arith.constant 0 : i32
    %c0_i32_0 = arith.constant 0 : i32
    %c0_i32_1 = arith.constant 0 : i32
    return %c0_i32, %c0_i32_0 : i32, i32
  }
  func.func @transform_4(%arg0: i32) -> (i32, i32) {
    %c0_i32 = arith.constant 0 : i32
    %c0_i32_0 = arith.constant 0 : i32
    %c0_i32_1 = arith.constant 0 : i32
    return %c0_i32, %c0_i32_0 : i32, i32
  }
  func.func @transform_5(%arg0: i32) -> (i32, i32, i32) {
    %c0_i32 = arith.constant 0 : i32
    %c0_i32_0 = arith.constant 0 : i32
    %c0_i32_1 = arith.constant 0 : i32
    return %c0_i32, %arg0, %c0_i32_0 : i32, i32, i32
  }
  func.func @transform_6(%arg0: i32) -> (i32, i32, i32) {
    %c0_i32 = arith.constant 0 : i32
    %c0_i32_0 = arith.constant 0 : i32
    %c0_i32_1 = arith.constant 0 : i32
    return %c0_i32, %arg0, %c0_i32_0 : i32, i32, i32
  }
  func.func @transform_7(%arg0: i32) -> (i32, i32, i32) {
    %c0_i32 = arith.constant 0 : i32
    %c0_i32_0 = arith.constant 0 : i32
    %c0_i32_1 = arith.constant 0 : i32
    return %c0_i32, %arg0, %c0_i32_0 : i32, i32, i32
  }
}

</mosaic_0001>

<bundles_post_ra>
// kernel: tpu_custom_call.1
= control target key start
LH: loop header
LB: loop body
LE: loop exit
PB: predicated region body
PF: predicated region fallthrough
CT: control target
= control target key end

     0   :  { %s3000_s24 = smov 0   ;;  %s3002_s25 = smov 0   ;;  %s4362_s0 = inlined_call_operand.vmem [shape: f32[256,64], index: 0, kind: input, shape index: {}]   ;;  %s4363_s1 = inlined_call_operand.vmem [shape: f32[1,64], index: 1, kind: input, shape index: {}]   ;;  %s4364_s2 = inlined_call_operand.vmem [shape: f32[1,64], index: 2, kind: input, shape index: {}]   ;;  %s4365_s3 = inlined_call_operand.vmem [shape: bf16[64,192], index: 3, kind: input, shape index: {}]   ;;  %s4366_s4 = inlined_call_operand.vmem [shape: f32[1,192], index: 4, kind: input, shape index: {}]   ;;  %s4367_s5 = inlined_call_operand.vmem [shape: bf16[4,256,16], index: 5, kind: output, shape index: {0}]   ;;  %s4368_s6 = inlined_call_operand.vmem [shape: bf16[4,256,16], index: 6, kind: output, shape index: {1}]   ;;  %s4369_s7 = inlined_call_operand.vmem [shape: bf16[4,256,16], index: 7, kind: output, shape index: {2}]  }
   0x1   :  { %s3004_s26 = smov 0  }
   0x2 LB: > { %s3013_s27 = sadd.s32 4294967295, %s2950_s26   ;;  %s3015_s28 = sadd.s32 1, %s2950_s26   ;;  %s2950_s26 = sphi %s3004_s26, %s4373_s26   ;;  %s2946_s25 = sphi %s3002_s25, %s4372_s25   ;;  %s2942_s24 = sphi %s3000_s24, %s4371_s24  }
   0x3   : > { %s132_s29 = ssub.s32 %s2950_s26, %s3015_s28  ;;  %s135_s30 = sadd.s32 1, %s2946_s25 }
   0x4   : > { %p133_p0 = scmp.eq.s32.totalorder %s132_s29, 0  ;;  %p145_p1 = scmp.ne.s32.totalorder %s2946_s25, %s2942_s24 }
   0x5   : > { %p146_p2 = scmp.eq.s32.totalorder %s3013_s27, 1  ;;  %p2598_p3 = scmp.ge.s32.totalorder %s2950_s26, 1 }
   0x6   : > { %s3023_s8 = scalar_select %p133_p0, %s2946_s25, %s135_s30  }
   0x7   : > { %p3025_p4 = por %p146_p2, %p145_p1  ;;  %p243_p5 = scmp.lt.s32.totalorder %s2950_s26, 3 }
   0x9   : > { %p244_p6 = pnand %p2598_p3, %p243_p5 }
   0xa   : > { %s2602_s10 = sshll.u32 (!%p244_p6), %s3013_s27, 4  ;;  %s267_s20 = sand.u32 (!%p244_p6), 1, %s2942_s24  }
   0xb   : > { %247 = sbr.rel (%p244_p6) target bundleno = 1008 (0x3f0), region = 40  ;;  %p283_p7 = scmp.lt.s32.totalorder (!%p244_p6), %s2602_s10, 31 }
   0xc   : > { %s3291_s21 = sshll.u32 (!%p244_p6), %s267_s20, 8  ;;  %s2953_s24 = smov (!%p244_p6), 64  }
   0xd   : > { %s3300_s22 = scalar_lea.vmem (!%p244_p6), [#allocation2], %s3291_s21  ;;  %s3312_s23 = scalar_lea.vmem (!%p244_p6), [#allocation4], %s3291_s21 }
   0xe   : > { %s2954_s26 = smov (!%p244_p6), 112   ;;  %s2955_s29 = smov (!%p244_p6), 48  }
   0xf   : > { %s2956_s30 = smov (!%p244_p6), 96   ;;  %s2959_s12 = smov (!%p244_p6), 16  }
  0x10   : > { %s4375_s10 = smov (!%p283_p7, %s2602_s10), 31  ;;  %vm310_vm0 = vcmask 523264   ;;  %vm841_vm1 = vcmask 125952   ;;  %s3608_s13 = scalar_lea.vmem [#allocation3], %s3291_s21 }
  0x11   : > { %s2603_s11 = sshll.u32 %s4375_s10, 3  ;;  %s2957_s10 = smov 32  }
  0x12   : > { %s3033_s14 = scalar_lea.vmem %s4362_s0, %s2603_s11  ;;  %s2958_s11 = smov 80  }
  0x13   : > { %v292_v0 = vld [vmem:[%s3033_s14] sm:$0xff]  ;;  %v293_v2 = vld [vmem:[%s3033_s14 + $0x8] sm:$0xff]  ;;  %v294_v8 = vld [vmem:[%s3033_s14 + $0x10] sm:$0xff] }
  0x14   : > { %v300_v1 = vld [vmem:[%s3033_s14 + $0x40] sm:$0xff]  ;;  %v311_v3 = vsel %vm310_vm0, %v292_v0, 0.0  ;;  %v301_v5 = vld [vmem:[%s3033_s14 + $0x48] sm:$0xff]  ;;  %v314_v6 = vsel %vm310_vm0, %v293_v2, 0.0  ;;  %v295_v9 = vld [vmem:[%s3033_s14 + $0x18] sm:$0xff]  ;;  %v317_v10 = vsel %vm310_vm0, %v294_v8, 0.0 }
  0x15   : > { %v335_v4 = vsel %vm310_vm0, %v300_v1, 0.0  ;;  %312 = vadd.xlane.f32.xlu0 %v311_v3  ;;  %v338_v7 = vsel %vm310_vm0, %v301_v5, 0.0  ;;  %v320_v11 = vsel %vm310_vm0, %v295_v9, 0.0  ;;  %v3048_v12 = vld [vmem:[%s3033_s14 + $0x50] sm:$0xff]  ;;  %v3051_v13 = vld [vmem:[%s3033_s14 + $0x58] sm:$0xff]  ;;  %v3058_v16 = vld [vmem:[%s3033_s14 + $0x20] sm:$0xff] }
  0x16   : > { %336 = vadd.xlane.f32.xlu1 %v335_v4  ;;  %v341_v14 = vsel %vm310_vm0, %v3048_v12, 0.0  ;;  %v344_v15 = vsel %vm310_vm0, %v3051_v13, 0.0  ;;  %v3061_v17 = vld [vmem:[%s3033_s14 + $0x28] sm:$0xff]  ;;  %v323_v18 = vsel %vm310_vm0, %v3058_v16, 0.0  ;;  %v3068_v20 = vld [vmem:[%s3033_s14 + $0x60] sm:$0xff]  ;;  %v3078_v24 = vld [vmem:[%s3033_s14 + $0x30] sm:$0xff] }
  0x17   : > { %v326_v19 = vsel %vm310_vm0, %v3061_v17, 0.0  ;;  %v3071_v21 = vld [vmem:[%s3033_s14 + $0x68] sm:$0xff]  ;;  %v347_v22 = vsel %vm310_vm0, %v3068_v20, 0.0  ;;  %v3081_v25 = vld [vmem:[%s3033_s14 + $0x38] sm:$0xff]  ;;  %v329_v26 = vsel %vm310_vm0, %v3078_v24, 0.0  ;;  %v3088_v28 = vld [vmem:[%s3033_s14 + $0x70] sm:$0xff] }
  0x18   : > { %v350_v23 = vsel %vm310_vm0, %v3071_v21, 0.0  ;;  %v332_v27 = vsel %vm310_vm0, %v3081_v25, 0.0  ;;  %v3091_v29 = vld [vmem:[%s3033_s14 + $0x78] sm:$0xff]  ;;  %v353_v30 = vsel %vm310_vm0, %v3088_v28, 0.0  ;;  %s2841_s14 = sshll.u32 (%p3025_p4), %s3013_s27, 6 }
  0x19   : > { %315 = vadd.xlane.f32.xlu0 %v314_v6  ;;  %v356_v31 = vsel %vm310_vm0, %v3091_v29, 0.0  ;;  %s4145_s17 = scalar_lea.vmem (%p3025_p4), %s4367_s5, %s2841_s14 }
  0x1a   : > { %339 = vadd.xlane.f32.xlu1 %v338_v7 }
  0x1d   : > { %318 = vadd.xlane.f32.xlu0 %v317_v10 }
  0x1e   : > { %321 = vadd.xlane.f32.xlu1 %v320_v11 }
  0x21   : > { %342 = vadd.xlane.f32.xlu0 %v341_v14 }
  0x22   : > { %345 = vadd.xlane.f32.xlu1 %v344_v15 }
  0x25   : > { %324 = vadd.xlane.f32.xlu0 %v323_v18 }
  0x26   : > { %327 = vadd.xlane.f32.xlu1 %v326_v19 }
  0x29   : > { %348 = vadd.xlane.f32.xlu0 %v347_v22 }
  0x2a   : > { %351 = vadd.xlane.f32.xlu1 %v350_v23 }
  0x2d   : > { %330 = vadd.xlane.f32.xlu0 %v329_v26 }
  0x2e   : > { %333 = vadd.xlane.f32.xlu1 %v332_v27 }
  0x31   : > { %354 = vadd.xlane.f32.xlu0 %v353_v30 }
  0x32   : > { %357 = vadd.xlane.f32.xlu1 %v356_v31 }
  0x9e   : > { %v313_v32 = vpop.xlane.xlu0 %312 }
  0x9f   : > { %v337_v33 = vpop.xlane.xlu1 %336  ;;  %v360_v34 = vmul.f32 0.015625, %v313_v32 }
  0xa0   : > { %v368_v35 = vmul.f32 0.015625, %v337_v33 }
  0xa1   : > { %v3097_v36 = vsub.f32 %v292_v0, %v360_v34 }
  0xa2   : > { %v3099_v37 = vsub.f32 %v300_v1, %v368_v35  ;;  %v316_v38 = vpop.xlane.xlu0 %315 }
  0xa3   : > { %v340_v39 = vpop.xlane.xlu1 %339  ;;  %v361_v40 = vmul.f32 0.015625, %v316_v38  ;;  %v392_v42 = vmul.f32 %v3097_v36, %v3097_v36 }
  0xa4   : > { %v369_v41 = vmul.f32 0.015625, %v340_v39  ;;  %v400_v43 = vmul.f32 %v3099_v37, %v3099_v37 }
  0xa5   : > { %v3105_v44 = vsub.f32 %v293_v2, %v361_v40  ;;  %v408_v46 = vsel %vm310_vm0, %v392_v42, 0.0 }
  0xa6   : > { %v3107_v45 = vsub.f32 %v301_v5, %v369_v41  ;;  %409 = vadd.xlane.f32.xlu0 %v408_v46  ;;  %v319_v47 = vpop.xlane.xlu0 %318  ;;  %v432_v49 = vsel %vm310_vm0, %v400_v43, 0.0 }
  0xa7   : > { %v322_v48 = vpop.xlane.xlu1 %321  ;;  %v362_v50 = vmul.f32 0.015625, %v319_v47  ;;  %v393_v52 = vmul.f32 %v3105_v44, %v3105_v44 }
  0xa8   : > { %v363_v51 = vmul.f32 0.015625, %v322_v48  ;;  %v401_v53 = vmul.f32 %v3107_v45, %v3107_v45 }
  0xa9   : > { %v3115_v54 = vsub.f32 %v294_v8, %v362_v50  ;;  %v411_v56 = vsel %vm310_vm0, %v393_v52, 0.0  ;;  %v2886_v50 = vld [vmem:[%s4365_s3 + $0x30] ss:$8 sps:$4 sm:$0xff]  }
  0xaa   : > { %v3117_v55 = vsub.f32 %v295_v9, %v363_v51  ;;  %433 = vadd.xlane.f32.xlu0 %v432_v49  ;;  %412 = vadd.xlane.f32.xlu1 %v411_v56  ;;  %v343_v57 = vpop.xlane.xlu0 %342  ;;  %v435_v59 = vsel %vm310_vm0, %v401_v53, 0.0  ;;  %v2884_v49 = vld [vmem:[%s4365_s3 + $0x34] ss:$8 sps:$4 sm:$0xff]   ;;  %v2887_v53 = vld [vmem:[%s4365_s3 + $0x24] ss:$8 sps:$4 sm:$0xff]  }
  0xab   : > { %v346_v58 = vpop.xlane.xlu1 %345  ;;  %v370_v60 = vmul.f32 0.015625, %v343_v57  ;;  %v394_v62 = vmul.f32 %v3115_v54, %v3115_v54  ;;  %664 = vmatprep.subr.bf16.mxu0 %v2884_v49  ;;  %2844 = vmatprep.subr.bf16.mxu1 %v2884_v49  ;;  %v2889_v56 = vld [vmem:[%s4365_s3 + $0x20] ss:$8 sps:$4 sm:$0xff]  }
  0xac   : > { %v371_v61 = vmul.f32 0.015625, %v346_v58  ;;  %v395_v63 = vmul.f32 %v3117_v55, %v3117_v55  ;;  %665 = vmatpush1.bf16.msra.mxu0 %v2886_v50  ;;  %2848 = vmatpush1.bf16.msra.mxu1 %v2886_v50  ;;  %v2890_v58 = vld [vmem:[%s4365_s3 + $0x14] ss:$8 sps:$4 sm:$0xff]  }
  0xad   : > { %v3126_v0 = vsub.f32 %v3048_v12, %v370_v60  ;;  %v414_v2 = vsel %vm310_vm0, %v394_v62, 0.0  ;;  %666 = vmatprep.subr.bf16.mxu0 %v2887_v53  ;;  %2845 = vmatprep.subr.bf16.mxu1 %v2887_v53  ;;  %v2893_v60 = vld [vmem:[%s4365_s3 + $0x4] ss:$8 sps:$4 sm:$0xff]   ;;  %v2952_v62 = vmov 0  }
  0xae   : > { %v3129_v1 = vsub.f32 %v3051_v13, %v371_v61  ;;  %436 = vadd.xlane.f32.xlu1 %v435_v59  ;;  %415 = vadd.xlane.f32.xlu0 %v414_v2  ;;  %v325_v3 = vpop.xlane.xlu0 %324  ;;  %v417_v5 = vsel %vm310_vm0, %v395_v63, 0.0  ;;  %v2892_v59 = vld [vmem:[%s4365_s3 + $0x10] ss:$8 sps:$4 sm:$0xff]   ;;  %v2895_v61 = vld [vmem:[%s4365_s3] ss:$8 sps:$4 sm:$0xff]  }
  0xaf   : > { %v328_v4 = vpop.xlane.xlu1 %327  ;;  %v364_v6 = vmul.f32 0.015625, %v325_v3  ;;  %v402_v8 = vmul.f32 %v3126_v0, %v3126_v0  ;;  %688 = vmatprep.mubr.bf16.mxu0 %v2952_v62  ;;  %728 = vmatprep.mubr.bf16.mxu1 %v2952_v62 }
  0xb0   : > { %v365_v7 = vmul.f32 0.015625, %v328_v4  ;;  %v403_v9 = vmul.f32 %v3129_v1, %v3129_v1  ;;  %667 = vmatpush1.bf16.msra.mxu0 %v2889_v56  ;;  %2849 = vmatpush1.bf16.msra.mxu1 %v2889_v56 }
  0xb1   : > { %v3138_v10 = vsub.f32 %v3058_v16, %v364_v6  ;;  %v438_v12 = vsel %vm310_vm0, %v402_v8, 0.0  ;;  %668 = vmatprep.subr.bf16.mxu0 %v2890_v58  ;;  %2846 = vmatprep.subr.bf16.mxu1 %v2890_v58 }
  0xb2   : > { %v3141_v11 = vsub.f32 %v3061_v17, %v365_v7  ;;  %418 = vadd.xlane.f32.xlu1 %v417_v5  ;;  %439 = vadd.xlane.f32.xlu0 %v438_v12  ;;  %v349_v13 = vpop.xlane.xlu0 %348  ;;  %v441_v15 = vsel %vm310_vm0, %v403_v9, 0.0 }
  0xb3   : > { %v352_v14 = vpop.xlane.xlu1 %351  ;;  %v372_v18 = vmul.f32 0.015625, %v349_v13  ;;  %v396_v22 = vmul.f32 %v3138_v10, %v3138_v10 }
  0xb4   : > { %v373_v19 = vmul.f32 0.015625, %v352_v14  ;;  %v397_v16 = vmul.f32 %v3141_v11, %v3141_v11  ;;  %669 = vmatpush1.bf16.msra.mxu0 %v2892_v59  ;;  %2850 = vmatpush1.bf16.msra.mxu1 %v2892_v59 }
  0xb5   : > { %v3150_v23 = vsub.f32 %v3068_v20, %v372_v18  ;;  %v420_v26 = vsel %vm310_vm0, %v396_v22, 0.0  ;;  %670 = vmatprep.subr.bf16.mxu0 %v2893_v60  ;;  %2847 = vmatprep.subr.bf16.mxu1 %v2893_v60 }
  0xb6   : > { %v3153_v17 = vsub.f32 %v3071_v21, %v373_v19  ;;  %442 = vadd.xlane.f32.xlu1 %v441_v15  ;;  %421 = vadd.xlane.f32.xlu0 %v420_v26  ;;  %v331_v27 = vpop.xlane.xlu0 %330  ;;  %v423_v31 = vsel %vm310_vm0, %v397_v16, 0.0 }
  0xb7   : > { %v334_v30 = vpop.xlane.xlu1 %333  ;;  %v366_v32 = vmul.f32 0.015625, %v331_v27  ;;  %v404_v34 = vmul.f32 %v3150_v23, %v3150_v23 }
  0xb8   : > { %v367_v33 = vmul.f32 0.015625, %v334_v30  ;;  %v405_v20 = vmul.f32 %v3153_v17, %v3153_v17  ;;  %671 = vmatpush1.bf16.msra.mxu0 %v2895_v61  ;;  %2851 = vmatpush1.bf16.msra.mxu1 %v2895_v61 }
  0xb9   : > { %v3162_v35 = vsub.f32 %v3078_v24, %v366_v32  ;;  %v444_v38 = vsel %vm310_vm0, %v404_v34, 0.0 }
  0xba   : > { %v3165_v21 = vsub.f32 %v3081_v25, %v367_v33  ;;  %424 = vadd.xlane.f32.xlu1 %v423_v31  ;;  %445 = vadd.xlane.f32.xlu0 %v444_v38  ;;  %v355_v39 = vpop.xlane.xlu0 %354  ;;  %v447_v41 = vsel %vm310_vm0, %v405_v20, 0.0 }
  0xbb   : > { %v358_v40 = vpop.xlane.xlu1 %357  ;;  %v374_v42 = vmul.f32 0.015625, %v355_v39  ;;  %v398_v46 = vmul.f32 %v3162_v35, %v3162_v35 }
  0xbc   : > { %v375_v43 = vmul.f32 0.015625, %v358_v40  ;;  %v399_v24 = vmul.f32 %v3165_v21, %v3165_v21 }
  0xbd   : > { %v3174_v47 = vsub.f32 %v3088_v28, %v374_v42  ;;  %v426_v48 = vsel %vm310_vm0, %v398_v46, 0.0 }
  0xbe   : > { %v3177_v25 = vsub.f32 %v3091_v29, %v375_v43  ;;  %448 = vadd.xlane.f32.xlu1 %v447_v41  ;;  %427 = vadd.xlane.f32.xlu0 %v426_v48  ;;  %v429_v51 = vsel %vm310_vm0, %v399_v24, 0.0  ;;  %v3216_v41 = vld [vmem:[%s4363_s1] ss:$0 sm:$0xff] }
  0xbf   : > { %v406_v28 = vmul.f32 %v3174_v47, %v3174_v47 }
  0xc0   : > { %v407_v29 = vmul.f32 %v3177_v25, %v3177_v25 }
  0xc1   : > { %v450_v52 = vsel %vm310_vm0, %v406_v28, 0.0 }
  0xc2   : > { %430 = vadd.xlane.f32.xlu1 %v429_v51  ;;  %451 = vadd.xlane.f32.xlu0 %v450_v52  ;;  %v453_v57 = vsel %vm310_vm0, %v407_v29, 0.0  ;;  %v3223_v52 = vld [vmem:[%s4364_s2] ss:$0 sm:$0xff] }
  0xc6   : > { %454 = vadd.xlane.f32.xlu1 %v453_v57 }
 0x12f   : > { %v410_v63 = vpop.xlane.xlu0 %409 }
 0x130   : > { %v456_v2 = vmul.f32 0.015625, %v410_v63 }
 0x132   : > { %v472_v3 = vadd.f32 1e-05, %v456_v2 }
 0x133   : > { %v413_v4 = vpop.xlane.xlu1 %412  ;;  %v434_v5 = vpop.xlane.xlu0 %433 }
 0x134   : > { %2896 = vrsqrt.f32 %v472_v3  ;;  %v457_v6 = vmul.f32 0.015625, %v413_v4  ;;  %v464_v7 = vmul.f32 0.015625, %v434_v5 }
 0x136   : > { %v473_v8 = vadd.f32 1e-05, %v457_v6  ;;  %v480_v9 = vadd.f32 1e-05, %v464_v7 }
 0x137   : > { %v437_v12 = vpop.xlane.xlu1 %436  ;;  %v416_v13 = vpop.xlane.xlu0 %415 }
 0x138   : > { %2898 = vrsqrt.f32 %v473_v8  ;;  %v465_v14 = vmul.f32 0.015625, %v437_v12  ;;  %v458_v15 = vmul.f32 0.015625, %v416_v13 }
 0x139   : > { %2900 = vrsqrt.f32 %v480_v9 }
 0x13a   : > { %v481_v18 = vadd.f32 1e-05, %v465_v14  ;;  %v474_v19 = vadd.f32 1e-05, %v458_v15 }
 0x13b   : > { %v419_v22 = vpop.xlane.xlu1 %418  ;;  %v440_v16 = vpop.xlane.xlu0 %439 }
 0x13c   : > { %2902 = vrsqrt.f32 %v481_v18  ;;  %v459_v26 = vmul.f32 0.015625, %v419_v22  ;;  %v466_v27 = vmul.f32 0.015625, %v440_v16 }
 0x13d   : > { %2904 = vrsqrt.f32 %v474_v19 }
 0x13e   : > { %v475_v30 = vadd.f32 1e-05, %v459_v26  ;;  %v482_v31 = vadd.f32 1e-05, %v466_v27 }
 0x13f   : > { %v443_v32 = vpop.xlane.xlu1 %442  ;;  %v422_v33 = vpop.xlane.xlu0 %421 }
 0x140   : > { %2906 = vrsqrt.f32 %v475_v30  ;;  %v467_v34 = vmul.f32 0.015625, %v443_v32  ;;  %v460_v20 = vmul.f32 0.015625, %v422_v33 }
 0x141   : > { %v2897_v38 = vpop.eup %2896  ;;  %2908 = vrsqrt.f32 %v482_v31 }
 0x142   : > { %v483_v39 = vadd.f32 1e-05, %v467_v34  ;;  %v476_v40 = vadd.f32 1e-05, %v460_v20  ;;  %v504_v42 = vmul.f32 %v2897_v38, %v3097_v36 }
 0x143   : > { %v425_v43 = vpop.xlane.xlu1 %424  ;;  %v446_v46 = vpop.xlane.xlu0 %445 }
 0x144   : > { %2910 = vrsqrt.f32 %v483_v39  ;;  %v461_v24 = vmul.f32 0.015625, %v425_v43  ;;  %v468_v48 = vmul.f32 0.015625, %v446_v46  ;;  %v526_v50 = vmul.f32 %v3216_v41, %v504_v42 }
 0x145   : > { %v2899_v49 = vpop.eup %2898  ;;  %2912 = vrsqrt.f32 %v476_v40 }
 0x146   : > { %v2901_v51 = vpop.eup %2900  ;;  %v477_v28 = vadd.f32 1e-05, %v461_v24  ;;  %v484_v29 = vadd.f32 1e-05, %v468_v48  ;;  %v505_v53 = vmul.f32 %v2899_v49, %v3105_v44  ;;  %v548_v63 = vadd.f32 %v3223_v52, %v526_v50 }
 0x147   : > { %v449_v36 = vpop.xlane.xlu1 %448  ;;  %v428_v56 = vpop.xlane.xlu0 %427  ;;  %v512_v57 = vmul.f32 %v2901_v51, %v3099_v37 }
 0x148   : > { %2914 = vrsqrt.f32 %v477_v28  ;;  %v469_v58 = vmul.f32 0.015625, %v449_v36  ;;  %v462_v59 = vmul.f32 0.015625, %v428_v56  ;;  %v527_v60 = vmul.f32 %v3216_v41, %v505_v53 }
 0x149   : > { %v2903_v61 = vpop.eup %2902  ;;  %2916 = vrsqrt.f32 %v484_v29  ;;  %v534_v37 = vmul.f32 %v3216_v41, %v512_v57 }
 0x14a   : > { %v2905_v2 = vpop.eup %2904  ;;  %v485_v3 = vadd.f32 1e-05, %v469_v58  ;;  %v478_v4 = vadd.f32 1e-05, %v462_v59  ;;  %v549_v5 = vadd.f32 %v3223_v52, %v527_v60  ;;  %v513_v44 = vmul.f32 %v2903_v61, %v3107_v45 }
 0x14b   : > { %v431_v6 = vpop.xlane.xlu1 %430  ;;  %v452_v7 = vpop.xlane.xlu0 %451  ;;  %v506_v8 = vmul.f32 %v2905_v2, %v3115_v54  ;;  %v556_v54 = vadd.f32 %v3223_v52, %v534_v37 }
 0x14c   : > { %2918 = vrsqrt.f32 %v485_v3  ;;  %v463_v9 = vmul.f32 0.015625, %v431_v6  ;;  %v470_v12 = vmul.f32 0.015625, %v452_v7  ;;  %v564_v13 = vpack.c.bf16 %v549_v5, %v548_v63 }
 0x14d   : > { %v2907_v14 = vpop.eup %2906  ;;  %2920 = vrsqrt.f32 %v478_v4  ;;  %v535_v15 = vmul.f32 %v3216_v41, %v513_v44  ;;  %v528_v18 = vmul.f32 %v3216_v41, %v506_v8 }
 0x14e   : > { %v2909_v19 = vpop.eup %2908  ;;  %v479_v22 = vadd.f32 1e-05, %v463_v9  ;;  %v486_v16 = vadd.f32 1e-05, %v470_v12  ;;  %2614 = vmatmul.mubr.msk.bf16.vlgmr.msra.gmra.mxu0 %vm310_vm0, %v564_v13  ;;  %v507_v45 = vmul.f32 %v2907_v14, %v3117_v55 }
 0x14f   : > { %v455_v26 = vpop.xlane.xlu1 %454  ;;  %v557_v27 = vadd.f32 %v3223_v52, %v535_v15  ;;  %698 = vmatprep.mubr.bf16.mxu0 %v2952_v62  ;;  %v514_v30 = vmul.f32 %v2909_v19, %v3126_v0  ;;  %v550_v20 = vadd.f32 %v3223_v52, %v528_v18  ;;  %v580_v19 = vld [vmem:[%s4366_s4] sm:$0x3] }
 0x150   : > { %2922 = vrsqrt.f32 %v479_v22  ;;  %v471_v31 = vmul.f32 0.015625, %v455_v26  ;;  %v529_v32 = vmul.f32 %v3216_v41, %v507_v45 }
 0x151   : > { %v2911_v33 = vpop.eup %2910  ;;  %2924 = vrsqrt.f32 %v486_v16  ;;  %v568_v34 = vpack.c.bf16 %v557_v27, %v556_v54  ;;  %v536_v42 = vmul.f32 %v3216_v41, %v514_v30 }
 0x152   : > { %v2913_v38 = vpop.eup %2912  ;;  %v487_v55 = vadd.f32 1e-05, %v471_v31  ;;  %v551_v39 = vadd.f32 %v3223_v52, %v529_v32  ;;  %v515_v40 = vmul.f32 %v2911_v33, %v3129_v1 }
 0x153   : > { %2618 = vmatmul.mubr.msk.bf16.vlgmr.msra.gmra.mxu1 %vm310_vm0, %v568_v34  ;;  %v508_v0 = vmul.f32 %v2913_v38, %v3138_v10  ;;  %v558_v49 = vadd.f32 %v3223_v52, %v536_v42 }
 0x154   : > { %2926 = vrsqrt.f32 %v487_v55  ;;  %v565_v43 = vpack.c.bf16 %v551_v39, %v550_v20  ;;  %738 = vmatprep.mubr.bf16.mxu1 %v2952_v62  ;;  %v537_v46 = vmul.f32 %v3216_v41, %v515_v40 }
 0x155   : > { %v2915_v24 = vpop.eup %2914  ;;  %v530_v51 = vmul.f32 %v3216_v41, %v508_v0 }
 0x156   : > { %v2917_v48 = vpop.eup %2916  ;;  %2615 = vmatmul.mubr.msk.bf16.gmra.mxu0 %vm310_vm0, %v565_v43  ;;  %v559_v1 = vadd.f32 %v3223_v52, %v537_v46  ;;  %v509_v50 = vmul.f32 %v2915_v24, %v3141_v11 }
 0x157   : > { %708 = vmatprep.mubr.bf16.mxu0 %v2952_v62  ;;  %v516_v10 = vmul.f32 %v2917_v48, %v3150_v23  ;;  %v552_v56 = vadd.f32 %v3223_v52, %v530_v51 }
 0x158   : > { %v569_v28 = vpack.c.bf16 %v559_v1, %v558_v49  ;;  %v531_v29 = vmul.f32 %v3216_v41, %v509_v50 }
 0x159   : > { %v2919_v53 = vpop.eup %2918  ;;  %v538_v59 = vmul.f32 %v3216_v41, %v516_v10 }
 0x15a   : > { %v2921_v36 = vpop.eup %2920  ;;  %v553_v57 = vadd.f32 %v3223_v52, %v531_v29  ;;  %v517_v58 = vmul.f32 %v2919_v53, %v3153_v17 }
 0x15b   : > { %2619 = vmatmul.mubr.msk.bf16.gmra.mxu1 %vm310_vm0, %v569_v28  ;;  %v510_v11 = vmul.f32 %v2921_v36, %v3162_v35  ;;  %v560_v2 = vadd.f32 %v3223_v52, %v538_v59 }
 0x15c   : > { %v566_v60 = vpack.c.bf16 %v553_v57, %v552_v56  ;;  %748 = vmatprep.mubr.bf16.mxu1 %v2952_v62  ;;  %v539_v23 = vmul.f32 %v3216_v41, %v517_v58 }
 0x15d   : > { %v2923_v61 = vpop.eup %2922  ;;  %v532_v4 = vmul.f32 %v3216_v41, %v510_v11 }
 0x15e   : > { %v2925_v63 = vpop.eup %2924  ;;  %2616 = vmatmul.mubr.msk.bf16.gmra.mxu0 %vm310_vm0, %v566_v60  ;;  %v561_v3 = vadd.f32 %v3223_v52, %v539_v23  ;;  %v511_v17 = vmul.f32 %v2923_v61, %v3165_v21 }
 0x15f   : > { %718 = vmatprep.mubr.bf16.mxu0 %v2952_v62  ;;  %v518_v35 = vmul.f32 %v2925_v63, %v3174_v47  ;;  %v554_v7 = vadd.f32 %v3223_v52, %v532_v4 }
 0x160   : > { %v570_v5 = vpack.c.bf16 %v561_v3, %v560_v2  ;;  %v533_v44 = vmul.f32 %v3216_v41, %v511_v17 }
 0x161   : > { %v2927_v6 = vpop.eup %2926  ;;  %v540_v9 = vmul.f32 %v3216_v41, %v518_v35 }
 0x162   : > { %v555_v37 = vadd.f32 %v3223_v52, %v533_v44  ;;  %v519_v8 = vmul.f32 %v2927_v6, %v3177_v25  ;;  %v582_v25 = vlaneseq }
 0x163   : > { %2620 = vmatmul.mubr.msk.bf16.gmra.mxu1 %vm310_vm0, %v570_v5  ;;  %v562_v12 = vadd.f32 %v3223_v52, %v540_v9 }
 0x164   : > { %v567_v21 = vpack.c.bf16 %v555_v37, %v554_v7  ;;  %758 = vmatprep.mubr.bf16.mxu1 %v2952_v62  ;;  %v541_v47 = vmul.f32 %v3216_v41, %v519_v8  ;;  %v583_v15 = vshrl.u32 %v582_v25, 7 }
 0x166   : > { %2617 = vmatmul.mubr.msk.bf16.gmra.mxu0 %vm310_vm0, %v567_v21  ;;  %v563_v13 = vadd.f32 %v3223_v52, %v541_v47  ;;  %v584_v18 = vsub.s32 0, %v583_v15  ;;  %v588_v22 = vsub.s32 1, %v583_v15 }
 0x168   : > { %v571_v14 = vpack.c.bf16 %v563_v13, %v562_v12  ;;  %v3289_v62 = vrot.slane %v580_v19, %v584_v18  ;;  %v3293_v41 = vrot.slane %v580_v19, %v588_v22 }
 0x16b   : > { %2621 = vmatmul.mubr.msk.bf16.gmra.mxu1 %vm310_vm0, %v571_v14 }
 0x20e   : > { %v690_v52 = vpop.f32.mrf.mxu0 }
 0x20f   : > { %v691_v16 = vadd.f32 %v690_v52, %v3289_v62 }
 0x210   : > { %v692_v45 = vpop.f32.mrf.mxu0 }
 0x211   : > { %v3296_v26 = vpack.c.bf16 %v691_v16, %v691_v16  ;;  %v693_v54 = vadd.f32 %v692_v45, %v3293_v41 }
 0x212   : > { %v694_v27 = vpop.f32.mrf.mxu0 }
 0x213   : > { %842 = vst.msk [vmem:[%s3300_s22] sm:$0xf] %vm841_vm1, %v3296_v26  ;;  %v3305_v30 = vpack.c.bf16 %v693_v54, %v693_v54  ;;  %v695_v31 = vadd.f32 %v694_v27, %v3289_v62  ;;  %v730_v32 = vpop.f32.mrf.mxu1  ;;  %858 = vrot.lane.b32.xlu0 %v3296_v26, %s2953_s24 }
 0x214   : > { %v731_v33 = vadd.f32 %v730_v32, %v3289_v62  ;;  %v696_v34 = vpop.f32.mrf.mxu0 }
 0x215   : > { %978 = vst.msk [vmem:[%s3312_s23] sm:$0xf] %vm841_vm1, %v3305_v30  ;;  %v3317_v20 = vpack.c.bf16 %v695_v31, %v695_v31  ;;  %v697_v38 = vadd.f32 %v696_v34, %v3293_v41  ;;  %v732_v55 = vpop.f32.mrf.mxu1 }
 0x216   : > { %v3320_v39 = vpack.c.bf16 %v731_v33, %v731_v33  ;;  %v733_v40 = vadd.f32 %v732_v55, %v3293_v41  ;;  %v700_v42 = vpop.f32.mrf.mxu0 }
 0x217   : > { %843 = vst.msk [vmem:[%s3300_s22 + $0x4] sm:$0xf] %vm841_vm1, %v3317_v20  ;;  %v3326_v0 = vpack.c.bf16 %v697_v38, %v697_v38  ;;  %v701_v43 = vadd.f32 %v700_v42, %v3289_v62  ;;  %v734_v46 = vpop.f32.mrf.mxu1  ;;  %860 = vrot.lane.b32.xlu1 %v3317_v20, %s2953_s24 }
 0x218   : > { %850 = vst.msk [vmem:[%s3300_s22 + $0x20] sm:$0xf] %vm841_vm1, %v3320_v39  ;;  %v3334_v24 = vpack.c.bf16 %v733_v40, %v733_v40  ;;  %v735_v48 = vadd.f32 %v734_v46, %v3289_v62  ;;  %874 = vrot.lane.b32.xlu0 %v3320_v39, %s2953_s24  ;;  %v702_v49 = vpop.f32.mrf.mxu0 }
 0x219   : > { %979 = vst.msk [vmem:[%s3312_s23 + $0x4] sm:$0xf] %vm841_vm1, %v3326_v0  ;;  %v3342_v1 = vpack.c.bf16 %v701_v43, %v701_v43  ;;  %v703_v50 = vadd.f32 %v702_v49, %v3293_v41  ;;  %v736_v51 = vpop.f32.mrf.mxu1 }
 0x21a   : > { %986 = vst.msk [vmem:[%s3312_s23 + $0x20] sm:$0xf] %vm841_vm1, %v3334_v24  ;;  %v3348_v10 = vpack.c.bf16 %v735_v48, %v735_v48  ;;  %v737_v28 = vadd.f32 %v736_v51, %v3293_v41  ;;  %v704_v29 = vpop.f32.mrf.mxu0 }
 0x21b   : > { %844 = vst.msk [vmem:[%s3300_s22 + $0x8] sm:$0xf] %vm841_vm1, %v3342_v1  ;;  %v3354_v53 = vpack.c.bf16 %v703_v50, %v703_v50  ;;  %v705_v36 = vadd.f32 %v704_v29, %v3289_v62  ;;  %v740_v56 = vpop.f32.mrf.mxu1 }
 0x21c   : > { %851 = vst.msk [vmem:[%s3300_s22 + $0x24] sm:$0xf] %vm841_vm1, %v3348_v10  ;;  %v3360_v57 = vpack.c.bf16 %v737_v28, %v737_v28  ;;  %v741_v58 = vadd.f32 %v740_v56, %v3289_v62  ;;  %876 = vrot.lane.b32.xlu1 %v3348_v10, %s2953_s24  ;;  %994 = vrot.lane.b32.xlu0 %v3296_v26, %s2954_s26  ;;  %v706_v59 = vpop.f32.mrf.mxu0 }
 0x21d   : > { %980 = vst.msk [vmem:[%s3312_s23 + $0x8] sm:$0xf] %vm841_vm1, %v3354_v53  ;;  %v3370_v11 = vpack.c.bf16 %v705_v36, %v705_v36  ;;  %v707_v60 = vadd.f32 %v706_v59, %v3293_v41  ;;  %v742_v23 = vpop.f32.mrf.mxu1 }
 0x21e   : > { %987 = vst.msk [vmem:[%s3312_s23 + $0x24] sm:$0xf] %vm841_vm1, %v3360_v57  ;;  %v3376_v61 = vpack.c.bf16 %v741_v58, %v741_v58  ;;  %v743_v63 = vadd.f32 %v742_v23, %v3293_v41  ;;  %v710_v2 = vpop.f32.mrf.mxu0 }
 0x21f   : > { %845 = vst.msk [vmem:[%s3300_s22 + $0xc] sm:$0xf] %vm841_vm1, %v3370_v11  ;;  %v3382_v3 = vpack.c.bf16 %v707_v60, %v707_v60  ;;  %v711_v17 = vadd.f32 %v710_v2, %v3289_v62  ;;  %v744_v4 = vpop.f32.mrf.mxu1 }
 0x220   : > { %852 = vst.msk [vmem:[%s3300_s22 + $0x28] sm:$0xf] %vm841_vm1, %v3376_v61  ;;  %v3388_v35 = vpack.c.bf16 %v743_v63, %v743_v63  ;;  %v745_v5 = vadd.f32 %v744_v4, %v3289_v62  ;;  %996 = vrot.lane.b32.xlu1 %v3317_v20, %s2954_s26  ;;  %1010 = vrot.lane.b32.xlu0 %v3320_v39, %s2954_s26  ;;  %v712_v44 = vpop.f32.mrf.mxu0 }
 0x221   : > { %981 = vst.msk [vmem:[%s3312_s23 + $0xc] sm:$0xf] %vm841_vm1, %v3382_v3  ;;  %v3398_v6 = vpack.c.bf16 %v711_v17, %v711_v17  ;;  %v713_v7 = vadd.f32 %v712_v44, %v3293_v41  ;;  %v746_v37 = vpop.f32.mrf.mxu1 }
 0x222   : > { %988 = vst.msk [vmem:[%s3312_s23 + $0x28] sm:$0xf] %vm841_vm1, %v3388_v35  ;;  %v3404_v8 = vpack.c.bf16 %v745_v5, %v745_v5  ;;  %v747_v9 = vadd.f32 %v746_v37, %v3293_v41  ;;  %v714_v21 = vpop.f32.mrf.mxu0 }
 0x223   : > { %846 = vst.msk [vmem:[%s3300_s22 + $0x10] sm:$0xf] %vm841_vm1, %v3398_v6  ;;  %v3410_v47 = vpack.c.bf16 %v713_v7, %v713_v7  ;;  %v715_v12 = vadd.f32 %v714_v21, %v3289_v62  ;;  %v750_v13 = vpop.f32.mrf.mxu1 }
 0x224   : > { %853 = vst.msk [vmem:[%s3300_s22 + $0x2c] sm:$0xf] %vm841_vm1, %v3404_v8  ;;  %v3416_v14 = vpack.c.bf16 %v747_v9, %v747_v9  ;;  %v751_v25 = vadd.f32 %v750_v13, %v3289_v62  ;;  %1012 = vrot.lane.b32.xlu1 %v3348_v10, %s2954_s26  ;;  %1059 = vrot.lane.b32.xlu0 %v3296_v26, %s2955_s29  ;;  %v716_v15 = vpop.f32.mrf.mxu0 }
 0x225   : > { %982 = vst.msk [vmem:[%s3312_s23 + $0x10] sm:$0xf] %vm841_vm1, %v3410_v47  ;;  %v3426_v18 = vpack.c.bf16 %v715_v12, %v715_v12  ;;  %v717_v19 = vadd.f32 %v716_v15, %v3293_v41  ;;  %v752_v22 = vpop.f32.mrf.mxu1 }
 0x226   : > { %989 = vst.msk [vmem:[%s3312_s23 + $0x2c] sm:$0xf] %vm841_vm1, %v3416_v14  ;;  %v3432_v52 = vpack.c.bf16 %v751_v25, %v751_v25  ;;  %v753_v16 = vadd.f32 %v752_v22, %v3293_v41  ;;  %v720_v45 = vpop.f32.mrf.mxu0 }
 0x227   : > { %847 = vst.msk [vmem:[%s3300_s22 + $0x14] sm:$0xf] %vm841_vm1, %v3426_v18  ;;  %v3438_v54 = vpack.c.bf16 %v717_v19, %v717_v19  ;;  %v721_v27 = vadd.f32 %v720_v45, %v3289_v62  ;;  %v754_v31 = vpop.f32.mrf.mxu1 }
 0x228   : > { %854 = vst.msk [vmem:[%s3300_s22 + $0x30] sm:$0xf] %vm841_vm1, %v3432_v52  ;;  %v3444_v32 = vpack.c.bf16 %v753_v16, %v753_v16  ;;  %v755_v33 = vadd.f32 %v754_v31, %v3289_v62  ;;  %1061 = vrot.lane.b32.xlu1 %v3317_v20, %s2955_s29  ;;  %1075 = vrot.lane.b32.xlu0 %v3320_v39, %s2955_s29  ;;  %v722_v34 = vpop.f32.mrf.mxu0 }
 0x229   : > { %983 = vst.msk [vmem:[%s3312_s23 + $0x14] sm:$0xf] %vm841_vm1, %v3438_v54  ;;  %v3454_v38 = vpack.c.bf16 %v721_v27, %v721_v27  ;;  %v723_v55 = vadd.f32 %v722_v34, %v3293_v41  ;;  %v756_v40 = vpop.f32.mrf.mxu1 }
 0x22a   : > { %990 = vst.msk [vmem:[%s3312_s23 + $0x30] sm:$0xf] %vm841_vm1, %v3444_v32  ;;  %v3460_v42 = vpack.c.bf16 %v755_v33, %v755_v33  ;;  %v757_v43 = vadd.f32 %v756_v40, %v3293_v41  ;;  %v724_v46 = vpop.f32.mrf.mxu0 }
 0x22b   : > { %848 = vst.msk [vmem:[%s3300_s22 + $0x18] sm:$0xf] %vm841_vm1, %v3454_v38  ;;  %v3466_v48 = vpack.c.bf16 %v723_v55, %v723_v55  ;;  %v725_v49 = vadd.f32 %v724_v46, %v3289_v62  ;;  %v760_v50 = vpop.f32.mrf.mxu1 }
 0x22c   : > { %855 = vst.msk [vmem:[%s3300_s22 + $0x34] sm:$0xf] %vm841_vm1, %v3460_v42  ;;  %v3472_v51 = vpack.c.bf16 %v757_v43, %v757_v43  ;;  %v761_v28 = vadd.f32 %v760_v50, %v3289_v62  ;;  %1077 = vrot.lane.b32.xlu1 %v3348_v10, %s2955_s29  ;;  %1189 = vrot.lane.b32.xlu0 %v3296_v26, %s2956_s30  ;;  %v726_v29 = vpop.f32.mrf.mxu0 }
 0x22d   : > { %984 = vst.msk [vmem:[%s3312_s23 + $0x18] sm:$0xf] %vm841_vm1, %v3466_v48  ;;  %v3482_v36 = vpack.c.bf16 %v725_v49, %v725_v49  ;;  %v727_v56 = vadd.f32 %v726_v29, %v3293_v41  ;;  %v762_v58 = vpop.f32.mrf.mxu1 }
 0x22e   : > { %991 = vst.msk [vmem:[%s3312_s23 + $0x34] sm:$0xf] %vm841_vm1, %v3472_v51  ;;  %v3488_v59 = vpack.c.bf16 %v761_v28, %v761_v28  ;;  %v763_v60 = vadd.f32 %v762_v58, %v3293_v41 }
 0x22f   : > { %849 = vst.msk [vmem:[%s3300_s22 + $0x1c] sm:$0xf] %vm841_vm1, %v3482_v36  ;;  %v3494_v23 = vpack.c.bf16 %v727_v56, %v727_v56  ;;  %v764_v63 = vpop.f32.mrf.mxu1 }
 0x230   : > { %856 = vst.msk [vmem:[%s3300_s22 + $0x38] sm:$0xf] %vm841_vm1, %v3488_v59  ;;  %v3499_v2 = vpack.c.bf16 %v763_v60, %v763_v60  ;;  %v765_v17 = vadd.f32 %v764_v63, %v3289_v62  ;;  %1191 = vrot.lane.b32.xlu1 %v3317_v20, %s2956_s30  ;;  %1205 = vrot.lane.b32.xlu0 %v3320_v39, %s2956_s30 }
 0x231   : > { %985 = vst.msk [vmem:[%s3312_s23 + $0x1c] sm:$0xf] %vm841_vm1, %v3494_v23  ;;  %v766_v4 = vpop.f32.mrf.mxu1 }
 0x232   : > { %992 = vst.msk [vmem:[%s3312_s23 + $0x38] sm:$0xf] %vm841_vm1, %v3499_v2  ;;  %v3512_v5 = vpack.c.bf16 %v765_v17, %v765_v17  ;;  %v767_v44 = vadd.f32 %v766_v4, %v3293_v41 }
 0x234   : > { %857 = vst.msk [vmem:[%s3300_s22 + $0x3c] sm:$0xf] %vm841_vm1, %v3512_v5  ;;  %v3518_v62 = vpack.c.bf16 %v767_v44, %v767_v44  ;;  %1207 = vrot.lane.b32.xlu1 %v3348_v10, %s2956_s30  ;;  %1254 = vrot.lane.b32.xlu0 %v3296_v26, %s2957_s10 }
 0x236   : > { %993 = vst.msk [vmem:[%s3312_s23 + $0x3c] sm:$0xf] %vm841_vm1, %v3518_v62 }
 0x238   : > { %1256 = vrot.lane.b32.xlu1 %v3317_v20, %s2957_s10  ;;  %1270 = vrot.lane.b32.xlu0 %v3320_v39, %s2957_s10 }
 0x23c   : > { %1272 = vrot.lane.b32.xlu1 %v3348_v10, %s2957_s10  ;;  %1384 = vrot.lane.b32.xlu0 %v3296_v26, %s2958_s11 }
 0x240   : > { %1386 = vrot.lane.b32.xlu1 %v3317_v20, %s2958_s11  ;;  %1400 = vrot.lane.b32.xlu0 %v3320_v39, %s2958_s11 }
 0x244   : > { %1402 = vrot.lane.b32.xlu1 %v3348_v10, %s2958_s11  ;;  %1449 = vrot.lane.b32.xlu0 %v3296_v26, %s2959_s12 }
 0x248   : > { %1451 = vrot.lane.b32.xlu1 %v3317_v20, %s2959_s12  ;;  %1465 = vrot.lane.b32.xlu0 %v3320_v39, %s2959_s12 }
 0x24c   : > { %1467 = vrot.lane.b32.xlu1 %v3348_v10, %s2959_s12  ;;  %1124 = vrot.lane.b32.xlu0 %v3305_v30, %s2954_s26 }
 0x250   : > { %1126 = vrot.lane.b32.xlu1 %v3326_v0, %s2954_s26  ;;  %1140 = vrot.lane.b32.xlu0 %v3334_v24, %s2954_s26 }
 0x254   : > { %1142 = vrot.lane.b32.xlu1 %v3360_v57, %s2954_s26  ;;  %1319 = vrot.lane.b32.xlu0 %v3305_v30, %s2956_s30 }
 0x258   : > { %1321 = vrot.lane.b32.xlu1 %v3326_v0, %s2956_s30  ;;  %1335 = vrot.lane.b32.xlu0 %v3334_v24, %s2956_s30 }
 0x25c   : > { %1337 = vrot.lane.b32.xlu1 %v3360_v57, %s2956_s30  ;;  %1514 = vrot.lane.b32.xlu0 %v3305_v30, %s2958_s11 }
 0x260   : > { %1516 = vrot.lane.b32.xlu1 %v3326_v0, %s2958_s11  ;;  %1530 = vrot.lane.b32.xlu0 %v3334_v24, %s2958_s11 }
 0x264   : > { %1532 = vrot.lane.b32.xlu1 %v3360_v57, %s2958_s11  ;;  %878 = vrot.lane.b32.xlu0 %v3376_v61, %s2953_s24 }
 0x268   : > { %862 = vrot.lane.b32.xlu1 %v3342_v1, %s2953_s24  ;;  %998 = vrot.lane.b32.xlu0 %v3342_v1, %s2954_s26 }
 0x26c   : > { %864 = vrot.lane.b32.xlu1 %v3370_v11, %s2953_s24  ;;  %1014 = vrot.lane.b32.xlu0 %v3376_v61, %s2954_s26 }
 0x270   : > { %880 = vrot.lane.b32.xlu1 %v3404_v8, %s2953_s24  ;;  %1063 = vrot.lane.b32.xlu0 %v3342_v1, %s2955_s29 }
 0x274   : > { %1000 = vrot.lane.b32.xlu1 %v3370_v11, %s2954_s26  ;;  %1079 = vrot.lane.b32.xlu0 %v3376_v61, %s2955_s29 }
 0x278   : > { %1016 = vrot.lane.b32.xlu1 %v3404_v8, %s2954_s26  ;;  %1193 = vrot.lane.b32.xlu0 %v3342_v1, %s2956_s30 }
 0x27c   : > { %1065 = vrot.lane.b32.xlu1 %v3370_v11, %s2955_s29  ;;  %1209 = vrot.lane.b32.xlu0 %v3376_v61, %s2956_s30 }
 0x280   : > { %1081 = vrot.lane.b32.xlu1 %v3404_v8, %s2955_s29  ;;  %1258 = vrot.lane.b32.xlu0 %v3342_v1, %s2957_s10 }
 0x284   : > { %1195 = vrot.lane.b32.xlu1 %v3370_v11, %s2956_s30  ;;  %1274 = vrot.lane.b32.xlu0 %v3376_v61, %s2957_s10 }
 0x285   : > { %v859_v41 = vpop.permute.xlu0 %858 }
 0x286   : > { %906 = vst.msk [vmem:[%s3608_s13] sm:$0xf] %vm841_vm1, %v859_v41 }
 0x288   : > { %1211 = vrot.lane.b32.xlu1 %v3404_v8, %s2956_s30  ;;  %1388 = vrot.lane.b32.xlu0 %v3342_v1, %s2958_s11 }
 0x289   : > { %v861_v26 = vpop.permute.xlu1 %860 }
 0x28a   : > { %907 = vst.msk [vmem:[%s3608_s13 + $0x4] sm:$0xf] %vm841_vm1, %v861_v26  ;;  %v875_v30 = vpop.permute.xlu0 %874 }
 0x28b   : > { %914 = vst.msk [vmem:[%s3608_s13 + $0x20] sm:$0xf] %vm841_vm1, %v875_v30 }
 0x28c   : > { %1260 = vrot.lane.b32.xlu1 %v3370_v11, %s2957_s10  ;;  %1404 = vrot.lane.b32.xlu0 %v3376_v61, %s2958_s11 }
 0x28e   : > { %v877_v20 = vpop.permute.xlu1 %876  ;;  %v995_v39 = vpop.permute.xlu0 %994 }
 0x28f   : > { %915 = vst.msk [vmem:[%s3608_s13 + $0x24] sm:$0xf] %vm841_vm1, %v877_v20  ;;  %2654 = vst.msk [vmem:[%s3300_s22 + $0x40] sm:$0xf] %vm841_vm1, %v995_v39 }
 0x290   : > { %1276 = vrot.lane.b32.xlu1 %v3404_v8, %s2957_s10  ;;  %1453 = vrot.lane.b32.xlu0 %v3342_v1, %s2959_s12 }
 0x292   : > { %v997_v0 = vpop.permute.xlu1 %996  ;;  %v1011_v24 = vpop.permute.xlu0 %1010 }
 0x293   : > { %2655 = vst.msk [vmem:[%s3300_s22 + $0x44] sm:$0xf] %vm841_vm1, %v997_v0  ;;  %2662 = vst.msk [vmem:[%s3300_s22 + $0x60] sm:$0xf] %vm841_vm1, %v1011_v24 }
 0x294   : > { %1390 = vrot.lane.b32.xlu1 %v3370_v11, %s2958_s11  ;;  %1469 = vrot.lane.b32.xlu0 %v3376_v61, %s2959_s12 }
 0x296   : > { %v1013_v10 = vpop.permute.xlu1 %1012  ;;  %v1060_v57 = vpop.permute.xlu0 %1059 }
 0x297   : > { %2663 = vst.msk [vmem:[%s3300_s22 + $0x64] sm:$0xf] %vm841_vm1, %v1013_v10  ;;  %2670 = vst.msk [vmem:[%s3608_s13 + $0x40] sm:$0xf] %vm841_vm1, %v1060_v57 }
 0x298   : > { %1406 = vrot.lane.b32.xlu1 %v3404_v8, %s2958_s11  ;;  %1128 = vrot.lane.b32.xlu0 %v3354_v53, %s2954_s26 }
 0x29a   : > { %v1062_v1 = vpop.permute.xlu1 %1061  ;;  %v1076_v7 = vpop.permute.xlu0 %1075 }
 0x29b   : > { %2671 = vst.msk [vmem:[%s3608_s13 + $0x44] sm:$0xf] %vm841_vm1, %v1062_v1  ;;  %2678 = vst.msk [vmem:[%s3608_s13 + $0x60] sm:$0xf] %vm841_vm1, %v1076_v7 }
 0x29c   : > { %1455 = vrot.lane.b32.xlu1 %v3370_v11, %s2959_s12  ;;  %1144 = vrot.lane.b32.xlu0 %v3388_v35, %s2954_s26 }
 0x29e   : > { %v1078_v61 = vpop.permute.xlu1 %1077  ;;  %v1190_v37 = vpop.permute.xlu0 %1189 }
 0x29f   : > { %2679 = vst.msk [vmem:[%s3608_s13 + $0x64] sm:$0xf] %vm841_vm1, %v1078_v61  ;;  %2702 = vst.msk [vmem:[%s3300_s22 + $0x80] sm:$0xf] %vm841_vm1, %v1190_v37 }
 0x2a0   : > { %1471 = vrot.lane.b32.xlu1 %v3404_v8, %s2959_s12  ;;  %1323 = vrot.lane.b32.xlu0 %v3354_v53, %s2956_s30 }
 0x2a2   : > { %v1192_v11 = vpop.permute.xlu1 %1191  ;;  %v1206_v9 = vpop.permute.xlu0 %1205 }
 0x2a3   : > { %2703 = vst.msk [vmem:[%s3300_s22 + $0x84] sm:$0xf] %vm841_vm1, %v1192_v11  ;;  %2710 = vst.msk [vmem:[%s3300_s22 + $0xa0] sm:$0xf] %vm841_vm1, %v1206_v9 }
 0x2a4   : > { %1130 = vrot.lane.b32.xlu1 %v3382_v3, %s2954_s26  ;;  %1339 = vrot.lane.b32.xlu0 %v3388_v35, %s2956_s30 }
 0x2a6   : > { %v1208_v8 = vpop.permute.xlu1 %1207  ;;  %v1255_v21 = vpop.permute.xlu0 %1254 }
 0x2a7   : > { %2711 = vst.msk [vmem:[%s3300_s22 + $0xa4] sm:$0xf] %vm841_vm1, %v1208_v8  ;;  %2718 = vst.msk [vmem:[%s3608_s13 + $0x80] sm:$0xf] %vm841_vm1, %v1255_v21 }
 0x2a8   : > { %1146 = vrot.lane.b32.xlu1 %v3416_v14, %s2954_s26  ;;  %1518 = vrot.lane.b32.xlu0 %v3354_v53, %s2958_s11 }
 0x2aa   : > { %v1257_v12 = vpop.permute.xlu1 %1256  ;;  %v1271_v13 = vpop.permute.xlu0 %1270 }
 0x2ab   : > { %2719 = vst.msk [vmem:[%s3608_s13 + $0x84] sm:$0xf] %vm841_vm1, %v1257_v12  ;;  %2726 = vst.msk [vmem:[%s3608_s13 + $0xa0] sm:$0xf] %vm841_vm1, %v1271_v13 }
 0x2ac   : > { %1325 = vrot.lane.b32.xlu1 %v3382_v3, %s2956_s30  ;;  %1534 = vrot.lane.b32.xlu0 %v3388_v35, %s2958_s11 }
 0x2ae   : > { %v1273_v25 = vpop.permute.xlu1 %1272  ;;  %v1385_v15 = vpop.permute.xlu0 %1384 }
 0x2af   : > { %2727 = vst.msk [vmem:[%s3608_s13 + $0xa4] sm:$0xf] %vm841_vm1, %v1273_v25  ;;  %2750 = vst.msk [vmem:[%s3300_s22 + $0xc0] sm:$0xf] %vm841_vm1, %v1385_v15 }
 0x2b0   : > { %1341 = vrot.lane.b32.xlu1 %v3416_v14, %s2956_s30  ;;  %866 = vrot.lane.b32.xlu0 %v3398_v6, %s2953_s24 }
 0x2b2   : > { %v1387_v53 = vpop.permute.xlu1 %1386  ;;  %v1401_v19 = vpop.permute.xlu0 %1400 }
 0x2b3   : > { %2751 = vst.msk [vmem:[%s3300_s22 + $0xc4] sm:$0xf] %vm841_vm1, %v1387_v53  ;;  %2758 = vst.msk [vmem:[%s3300_s22 + $0xe0] sm:$0xf] %vm841_vm1, %v1401_v19 }
 0x2b4   : > { %1520 = vrot.lane.b32.xlu1 %v3382_v3, %s2958_s11  ;;  %882 = vrot.lane.b32.xlu0 %v3432_v52, %s2953_s24 }
 0x2b6   : > { %v1403_v35 = vpop.permute.xlu1 %1402  ;;  %v1450_v22 = vpop.permute.xlu0 %1449 }
 0x2b7   : > { %2759 = vst.msk [vmem:[%s3300_s22 + $0xe4] sm:$0xf] %vm841_vm1, %v1403_v35  ;;  %2766 = vst.msk [vmem:[%s3608_s13 + $0xc0] sm:$0xf] %vm841_vm1, %v1450_v22 }
 0x2b8   : > { %1536 = vrot.lane.b32.xlu1 %v3416_v14, %s2958_s11  ;;  %1002 = vrot.lane.b32.xlu0 %v3398_v6, %s2954_s26 }
 0x2ba   : > { %v1452_v3 = vpop.permute.xlu1 %1451  ;;  %v1466_v16 = vpop.permute.xlu0 %1465 }
 0x2bb   : > { %2767 = vst.msk [vmem:[%s3608_s13 + $0xc4] sm:$0xf] %vm841_vm1, %v1452_v3  ;;  %2774 = vst.msk [vmem:[%s3608_s13 + $0xe0] sm:$0xf] %vm841_vm1, %v1466_v16 }
 0x2bc   : > { %868 = vrot.lane.b32.xlu1 %v3426_v18, %s2953_s24  ;;  %1018 = vrot.lane.b32.xlu0 %v3432_v52, %s2954_s26 }
 0x2be   : > { %v1468_v14 = vpop.permute.xlu1 %1467  ;;  %v1125_v45 = vpop.permute.xlu0 %1124 }
 0x2bf   : > { %2775 = vst.msk [vmem:[%s3608_s13 + $0xe4] sm:$0xf] %vm841_vm1, %v1468_v14  ;;  %2686 = vst.msk [vmem:[%s3312_s23 + $0x40] sm:$0xf] %vm841_vm1, %v1125_v45 }
 0x2c0   : > { %884 = vrot.lane.b32.xlu1 %v3460_v42, %s2953_s24  ;;  %1067 = vrot.lane.b32.xlu0 %v3398_v6, %s2955_s29 }
 0x2c2   : > { %v1127_v27 = vpop.permute.xlu1 %1126  ;;  %v1141_v31 = vpop.permute.xlu0 %1140 }
 0x2c3   : > { %2687 = vst.msk [vmem:[%s3312_s23 + $0x44] sm:$0xf] %vm841_vm1, %v1127_v27  ;;  %2694 = vst.msk [vmem:[%s3312_s23 + $0x60] sm:$0xf] %vm841_vm1, %v1141_v31 }
 0x2c4   : > { %1004 = vrot.lane.b32.xlu1 %v3426_v18, %s2954_s26  ;;  %1083 = vrot.lane.b32.xlu0 %v3432_v52, %s2955_s29 }
 0x2c6   : > { %v1143_v33 = vpop.permute.xlu1 %1142  ;;  %v1320_v34 = vpop.permute.xlu0 %1319 }
 0x2c7   : > { %2695 = vst.msk [vmem:[%s3312_s23 + $0x64] sm:$0xf] %vm841_vm1, %v1143_v33  ;;  %2734 = vst.msk [vmem:[%s3312_s23 + $0x80] sm:$0xf] %vm841_vm1, %v1320_v34 }
 0x2c8   : > { %1020 = vrot.lane.b32.xlu1 %v3460_v42, %s2954_s26  ;;  %1197 = vrot.lane.b32.xlu0 %v3398_v6, %s2956_s30 }
 0x2ca   : > { %v1322_v55 = vpop.permute.xlu1 %1321  ;;  %v1336_v40 = vpop.permute.xlu0 %1335 }
 0x2cb   : > { %2735 = vst.msk [vmem:[%s3312_s23 + $0x84] sm:$0xf] %vm841_vm1, %v1322_v55  ;;  %2742 = vst.msk [vmem:[%s3312_s23 + $0xa0] sm:$0xf] %vm841_vm1, %v1336_v40 }
 0x2cc   : > { %1069 = vrot.lane.b32.xlu1 %v3426_v18, %s2955_s29  ;;  %1213 = vrot.lane.b32.xlu0 %v3432_v52, %s2956_s30 }
 0x2ce   : > { %v1338_v43 = vpop.permute.xlu1 %1337  ;;  %v1515_v46 = vpop.permute.xlu0 %1514 }
 0x2cf   : > { %2743 = vst.msk [vmem:[%s3312_s23 + $0xa4] sm:$0xf] %vm841_vm1, %v1338_v43  ;;  %2782 = vst.msk [vmem:[%s3312_s23 + $0xc0] sm:$0xf] %vm841_vm1, %v1515_v46 }
 0x2d0   : > { %1085 = vrot.lane.b32.xlu1 %v3460_v42, %s2955_s29  ;;  %1262 = vrot.lane.b32.xlu0 %v3398_v6, %s2957_s10 }
 0x2d2   : > { %v1517_v49 = vpop.permute.xlu1 %1516  ;;  %v1531_v50 = vpop.permute.xlu0 %1530 }
 0x2d3   : > { %2783 = vst.msk [vmem:[%s3312_s23 + $0xc4] sm:$0xf] %vm841_vm1, %v1517_v49  ;;  %2790 = vst.msk [vmem:[%s3312_s23 + $0xe0] sm:$0xf] %vm841_vm1, %v1531_v50 }
 0x2d4   : > { %1199 = vrot.lane.b32.xlu1 %v3426_v18, %s2956_s30  ;;  %1278 = vrot.lane.b32.xlu0 %v3432_v52, %s2957_s10 }
 0x2d6   : > { %v1533_v28 = vpop.permute.xlu1 %1532  ;;  %v879_v29 = vpop.permute.xlu0 %878 }
 0x2d7   : > { %2791 = vst.msk [vmem:[%s3312_s23 + $0xe4] sm:$0xf] %vm841_vm1, %v1533_v28  ;;  %916 = vst.msk [vmem:[%s3608_s13 + $0x28] sm:$0xf] %vm841_vm1, %v879_v29 }
 0x2d8   : > { %1215 = vrot.lane.b32.xlu1 %v3460_v42, %s2956_s30  ;;  %1392 = vrot.lane.b32.xlu0 %v3398_v6, %s2958_s11 }
 0x2da   : > { %v863_v56 = vpop.permute.xlu1 %862  ;;  %v999_v58 = vpop.permute.xlu0 %998 }
 0x2db   : > { %908 = vst.msk [vmem:[%s3608_s13 + $0x8] sm:$0xf] %vm841_vm1, %v863_v56  ;;  %2656 = vst.msk [vmem:[%s3300_s22 + $0x48] sm:$0xf] %vm841_vm1, %v999_v58 }
 0x2dc   : > { %1264 = vrot.lane.b32.xlu1 %v3426_v18, %s2957_s10  ;;  %1408 = vrot.lane.b32.xlu0 %v3432_v52, %s2958_s11 }
 0x2de   : > { %v865_v60 = vpop.permute.xlu1 %864  ;;  %v1015_v63 = vpop.permute.xlu0 %1014 }
 0x2df   : > { %909 = vst.msk [vmem:[%s3608_s13 + $0xc] sm:$0xf] %vm841_vm1, %v865_v60  ;;  %2664 = vst.msk [vmem:[%s3300_s22 + $0x68] sm:$0xf] %vm841_vm1, %v1015_v63 }
 0x2e0   : > { %1280 = vrot.lane.b32.xlu1 %v3460_v42, %s2957_s10  ;;  %1457 = vrot.lane.b32.xlu0 %v3398_v6, %s2959_s12 }
 0x2e2   : > { %v881_v17 = vpop.permute.xlu1 %880  ;;  %v1064_v4 = vpop.permute.xlu0 %1063 }
 0x2e3   : > { %917 = vst.msk [vmem:[%s3608_s13 + $0x2c] sm:$0xf] %vm841_vm1, %v881_v17  ;;  %2672 = vst.msk [vmem:[%s3608_s13 + $0x48] sm:$0xf] %vm841_vm1, %v1064_v4 }
 0x2e4   : > { %1394 = vrot.lane.b32.xlu1 %v3426_v18, %s2958_s11  ;;  %1473 = vrot.lane.b32.xlu0 %v3432_v52, %s2959_s12 }
 0x2e6   : > { %v1001_v44 = vpop.permute.xlu1 %1000  ;;  %v1080_v41 = vpop.permute.xlu0 %1079 }
 0x2e7   : > { %2657 = vst.msk [vmem:[%s3300_s22 + $0x4c] sm:$0xf] %vm841_vm1, %v1001_v44  ;;  %2680 = vst.msk [vmem:[%s3608_s13 + $0x68] sm:$0xf] %vm841_vm1, %v1080_v41 }
 0x2e8   : > { %1410 = vrot.lane.b32.xlu1 %v3460_v42, %s2958_s11  ;;  %1132 = vrot.lane.b32.xlu0 %v3410_v47, %s2954_s26 }
 0x2ea   : > { %v1017_v6 = vpop.permute.xlu1 %1016  ;;  %v1194_v26 = vpop.permute.xlu0 %1193 }
 0x2eb   : > { %2665 = vst.msk [vmem:[%s3300_s22 + $0x6c] sm:$0xf] %vm841_vm1, %v1017_v6  ;;  %2704 = vst.msk [vmem:[%s3300_s22 + $0x88] sm:$0xf] %vm841_vm1, %v1194_v26 }
 0x2ec   : > { %1459 = vrot.lane.b32.xlu1 %v3426_v18, %s2959_s12  ;;  %1148 = vrot.lane.b32.xlu0 %v3444_v32, %s2954_s26 }
 0x2ee   : > { %v1066_v52 = vpop.permute.xlu1 %1065  ;;  %v1210_v30 = vpop.permute.xlu0 %1209 }
 0x2ef   : > { %2673 = vst.msk [vmem:[%s3608_s13 + $0x4c] sm:$0xf] %vm841_vm1, %v1066_v52  ;;  %2712 = vst.msk [vmem:[%s3300_s22 + $0xa8] sm:$0xf] %vm841_vm1, %v1210_v30 }
 0x2f0   : > { %1475 = vrot.lane.b32.xlu1 %v3460_v42, %s2959_s12  ;;  %1327 = vrot.lane.b32.xlu0 %v3410_v47, %s2956_s30 }
 0x2f2   : > { %v1082_v18 = vpop.permute.xlu1 %1081  ;;  %v1259_v20 = vpop.permute.xlu0 %1258 }
 0x2f3   : > { %2681 = vst.msk [vmem:[%s3608_s13 + $0x6c] sm:$0xf] %vm841_vm1, %v1082_v18  ;;  %2720 = vst.msk [vmem:[%s3608_s13 + $0x88] sm:$0xf] %vm841_vm1, %v1259_v20 }
 0x2f4   : > { %1134 = vrot.lane.b32.xlu1 %v3438_v54, %s2954_s26  ;;  %1343 = vrot.lane.b32.xlu0 %v3444_v32, %s2956_s30 }
 0x2f6   : > { %v1196_v42 = vpop.permute.xlu1 %1195  ;;  %v1275_v39 = vpop.permute.xlu0 %1274 }
 0x2f7   : > { %2705 = vst.msk [vmem:[%s3300_s22 + $0x8c] sm:$0xf] %vm841_vm1, %v1196_v42  ;;  %2728 = vst.msk [vmem:[%s3608_s13 + $0xa8] sm:$0xf] %vm841_vm1, %v1275_v39 }
 0x2f8   : > { %1150 = vrot.lane.b32.xlu1 %v3472_v51, %s2954_s26  ;;  %1522 = vrot.lane.b32.xlu0 %v3410_v47, %s2958_s11 }
 0x2fa   : > { %v1212_v0 = vpop.permute.xlu1 %1211  ;;  %v1389_v24 = vpop.permute.xlu0 %1388 }
 0x2fb   : > { %2713 = vst.msk [vmem:[%s3300_s22 + $0xac] sm:$0xf] %vm841_vm1, %v1212_v0  ;;  %2752 = vst.msk [vmem:[%s3300_s22 + $0xc8] sm:$0xf] %vm841_vm1, %v1389_v24 }
 0x2fc   : > { %1329 = vrot.lane.b32.xlu1 %v3438_v54, %s2956_s30  ;;  %1538 = vrot.lane.b32.xlu0 %v3444_v32, %s2958_s11 }
 0x2fe   : > { %v1261_v10 = vpop.permute.xlu1 %1260  ;;  %v1405_v57 = vpop.permute.xlu0 %1404 }
 0x2ff   : > { %2721 = vst.msk [vmem:[%s3608_s13 + $0x8c] sm:$0xf] %vm841_vm1, %v1261_v10  ;;  %2760 = vst.msk [vmem:[%s3300_s22 + $0xe8] sm:$0xf] %vm841_vm1, %v1405_v57 }
 0x300   : > { %1345 = vrot.lane.b32.xlu1 %v3472_v51, %s2956_s30  ;;  %870 = vrot.lane.b32.xlu0 %v3454_v38, %s2953_s24 }
 0x302   : > { %v1277_v47 = vpop.permute.xlu1 %1276  ;;  %v1454_v1 = vpop.permute.xlu0 %1453 }
 0x303   : > { %2729 = vst.msk [vmem:[%s3608_s13 + $0xac] sm:$0xf] %vm841_vm1, %v1277_v47  ;;  %2768 = vst.msk [vmem:[%s3608_s13 + $0xc8] sm:$0xf] %vm841_vm1, %v1454_v1 }
 0x304   : > { %1524 = vrot.lane.b32.xlu1 %v3438_v54, %s2958_s11  ;;  %886 = vrot.lane.b32.xlu0 %v3488_v59, %s2953_s24 }
 0x306   : > { %v1391_v32 = vpop.permute.xlu1 %1390  ;;  %v1470_v7 = vpop.permute.xlu0 %1469 }
 0x307   : > { %2753 = vst.msk [vmem:[%s3300_s22 + $0xcc] sm:$0xf] %vm841_vm1, %v1391_v32  ;;  %2776 = vst.msk [vmem:[%s3608_s13 + $0xe8] sm:$0xf] %vm841_vm1, %v1470_v7 }
 0x308   : > { %1540 = vrot.lane.b32.xlu1 %v3472_v51, %s2958_s11  ;;  %1006 = vrot.lane.b32.xlu0 %v3454_v38, %s2954_s26 }
 0x30a   : > { %v1407_v54 = vpop.permute.xlu1 %1406  ;;  %v1129_v61 = vpop.permute.xlu0 %1128 }
 0x30b   : > { %2761 = vst.msk [vmem:[%s3300_s22 + $0xec] sm:$0xf] %vm841_vm1, %v1407_v54  ;;  %2688 = vst.msk [vmem:[%s3312_s23 + $0x48] sm:$0xf] %vm841_vm1, %v1129_v61 }
 0x30c   : > { %872 = vrot.lane.b32.xlu1 %v3482_v36, %s2953_s24  ;;  %1022 = vrot.lane.b32.xlu0 %v3488_v59, %s2954_s26 }
 0x30e   : > { %v1456_v51 = vpop.permute.xlu1 %1455  ;;  %v1145_v37 = vpop.permute.xlu0 %1144 }
 0x30f   : > { %2769 = vst.msk [vmem:[%s3608_s13 + $0xcc] sm:$0xf] %vm841_vm1, %v1456_v51  ;;  %2696 = vst.msk [vmem:[%s3312_s23 + $0x68] sm:$0xf] %vm841_vm1, %v1145_v37 }
 0x310   : > { %888 = vrot.lane.b32.xlu1 %v3512_v5, %s2953_s24  ;;  %1071 = vrot.lane.b32.xlu0 %v3454_v38, %s2955_s29 }
 0x312   : > { %v1472_v11 = vpop.permute.xlu1 %1471  ;;  %v1324_v9 = vpop.permute.xlu0 %1323 }
 0x313   : > { %2777 = vst.msk [vmem:[%s3608_s13 + $0xec] sm:$0xf] %vm841_vm1, %v1472_v11  ;;  %2736 = vst.msk [vmem:[%s3312_s23 + $0x88] sm:$0xf] %vm841_vm1, %v1324_v9 }
 0x314   : > { %1008 = vrot.lane.b32.xlu1 %v3482_v36, %s2954_s26  ;;  %1087 = vrot.lane.b32.xlu0 %v3488_v59, %s2955_s29 }
 0x316   : > { %v1131_v8 = vpop.permute.xlu1 %1130  ;;  %v1340_v21 = vpop.permute.xlu0 %1339 }
 0x317   : > { %2689 = vst.msk [vmem:[%s3312_s23 + $0x4c] sm:$0xf] %vm841_vm1, %v1131_v8  ;;  %2744 = vst.msk [vmem:[%s3312_s23 + $0xa8] sm:$0xf] %vm841_vm1, %v1340_v21 }
 0x318   : > { %1024 = vrot.lane.b32.xlu1 %v3512_v5, %s2954_s26  ;;  %1201 = vrot.lane.b32.xlu0 %v3454_v38, %s2956_s30 }
 0x31a   : > { %v1147_v12 = vpop.permute.xlu1 %1146  ;;  %v1519_v13 = vpop.permute.xlu0 %1518 }
 0x31b   : > { %2697 = vst.msk [vmem:[%s3312_s23 + $0x6c] sm:$0xf] %vm841_vm1, %v1147_v12  ;;  %2784 = vst.msk [vmem:[%s3312_s23 + $0xc8] sm:$0xf] %vm841_vm1, %v1519_v13 }
 0x31c   : > { %1073 = vrot.lane.b32.xlu1 %v3482_v36, %s2955_s29  ;;  %1217 = vrot.lane.b32.xlu0 %v3488_v59, %s2956_s30 }
 0x31e   : > { %v1326_v25 = vpop.permute.xlu1 %1325  ;;  %v1535_v15 = vpop.permute.xlu0 %1534 }
 0x31f   : > { %2737 = vst.msk [vmem:[%s3312_s23 + $0x8c] sm:$0xf] %vm841_vm1, %v1326_v25  ;;  %2792 = vst.msk [vmem:[%s3312_s23 + $0xe8] sm:$0xf] %vm841_vm1, %v1535_v15 }
 0x320   : > { %1089 = vrot.lane.b32.xlu1 %v3512_v5, %s2955_s29  ;;  %1266 = vrot.lane.b32.xlu0 %v3454_v38, %s2957_s10 }
 0x322   : > { %v1342_v53 = vpop.permute.xlu1 %1341  ;;  %v867_v19 = vpop.permute.xlu0 %866 }
 0x323   : > { %2745 = vst.msk [vmem:[%s3312_s23 + $0xac] sm:$0xf] %vm841_vm1, %v1342_v53  ;;  %910 = vst.msk [vmem:[%s3608_s13 + $0x10] sm:$0xf] %vm841_vm1, %v867_v19 }
 0x324   : > { %1203 = vrot.lane.b32.xlu1 %v3482_v36, %s2956_s30  ;;  %1282 = vrot.lane.b32.xlu0 %v3488_v59, %s2957_s10 }
 0x326   : > { %v1521_v35 = vpop.permute.xlu1 %1520  ;;  %v883_v22 = vpop.permute.xlu0 %882 }
 0x327   : > { %2785 = vst.msk [vmem:[%s3312_s23 + $0xcc] sm:$0xf] %vm841_vm1, %v1521_v35  ;;  %918 = vst.msk [vmem:[%s3608_s13 + $0x30] sm:$0xf] %vm841_vm1, %v883_v22 }
 0x328   : > { %1219 = vrot.lane.b32.xlu1 %v3512_v5, %s2956_s30  ;;  %1396 = vrot.lane.b32.xlu0 %v3454_v38, %s2958_s11 }
 0x32a   : > { %v1537_v3 = vpop.permute.xlu1 %1536  ;;  %v1003_v16 = vpop.permute.xlu0 %1002 }
 0x32b   : > { %2793 = vst.msk [vmem:[%s3312_s23 + $0xec] sm:$0xf] %vm841_vm1, %v1537_v3  ;;  %2658 = vst.msk [vmem:[%s3300_s22 + $0x50] sm:$0xf] %vm841_vm1, %v1003_v16 }
 0x32c   : > { %1268 = vrot.lane.b32.xlu1 %v3482_v36, %s2957_s10  ;;  %1412 = vrot.lane.b32.xlu0 %v3488_v59, %s2958_s11 }
 0x32e   : > { %v869_v14 = vpop.permute.xlu1 %868  ;;  %v1019_v45 = vpop.permute.xlu0 %1018 }
 0x32f   : > { %911 = vst.msk [vmem:[%s3608_s13 + $0x14] sm:$0xf] %vm841_vm1, %v869_v14  ;;  %2666 = vst.msk [vmem:[%s3300_s22 + $0x70] sm:$0xf] %vm841_vm1, %v1019_v45 }
 0x330   : > { %1284 = vrot.lane.b32.xlu1 %v3512_v5, %s2957_s10  ;;  %1461 = vrot.lane.b32.xlu0 %v3454_v38, %s2959_s12 }
 0x332   : > { %v885_v27 = vpop.permute.xlu1 %884  ;;  %v1068_v31 = vpop.permute.xlu0 %1067 }
 0x333   : > { %919 = vst.msk [vmem:[%s3608_s13 + $0x34] sm:$0xf] %vm841_vm1, %v885_v27  ;;  %2674 = vst.msk [vmem:[%s3608_s13 + $0x50] sm:$0xf] %vm841_vm1, %v1068_v31 }
 0x334   : > { %1398 = vrot.lane.b32.xlu1 %v3482_v36, %s2958_s11  ;;  %1477 = vrot.lane.b32.xlu0 %v3488_v59, %s2959_s12 }
 0x336   : > { %v1005_v33 = vpop.permute.xlu1 %1004  ;;  %v1084_v34 = vpop.permute.xlu0 %1083 }
 0x337   : > { %2659 = vst.msk [vmem:[%s3300_s22 + $0x54] sm:$0xf] %vm841_vm1, %v1005_v33  ;;  %2682 = vst.msk [vmem:[%s3608_s13 + $0x70] sm:$0xf] %vm841_vm1, %v1084_v34 }
 0x338   : > { %1414 = vrot.lane.b32.xlu1 %v3512_v5, %s2958_s11  ;;  %1136 = vrot.lane.b32.xlu0 %v3466_v48, %s2954_s26 }
 0x33a   : > { %v1021_v38 = vpop.permute.xlu1 %1020  ;;  %v1198_v55 = vpop.permute.xlu0 %1197 }
 0x33b   : > { %2667 = vst.msk [vmem:[%s3300_s22 + $0x74] sm:$0xf] %vm841_vm1, %v1021_v38  ;;  %2706 = vst.msk [vmem:[%s3300_s22 + $0x90] sm:$0xf] %vm841_vm1, %v1198_v55 }
 0x33c   : > { %1463 = vrot.lane.b32.xlu1 %v3482_v36, %s2959_s12  ;;  %1152 = vrot.lane.b32.xlu0 %v3499_v2, %s2954_s26 }
 0x33e   : > { %v1070_v59 = vpop.permute.xlu1 %1069  ;;  %v1214_v40 = vpop.permute.xlu0 %1213 }
 0x33f   : > { %2675 = vst.msk [vmem:[%s3608_s13 + $0x54] sm:$0xf] %vm841_vm1, %v1070_v59  ;;  %2714 = vst.msk [vmem:[%s3300_s22 + $0xb0] sm:$0xf] %vm841_vm1, %v1214_v40 }
 0x340   : > { %1479 = vrot.lane.b32.xlu1 %v3512_v5, %s2959_s12  ;;  %1331 = vrot.lane.b32.xlu0 %v3466_v48, %s2956_s30 }
 0x342   : > { %v1086_v36 = vpop.permute.xlu1 %1085  ;;  %v1263_v43 = vpop.permute.xlu0 %1262 }
 0x343   : > { %2683 = vst.msk [vmem:[%s3608_s13 + $0x74] sm:$0xf] %vm841_vm1, %v1086_v36  ;;  %2722 = vst.msk [vmem:[%s3608_s13 + $0x90] sm:$0xf] %vm841_vm1, %v1263_v43 }
 0x344   : > { %1138 = vrot.lane.b32.xlu1 %v3494_v23, %s2954_s26  ;;  %1347 = vrot.lane.b32.xlu0 %v3499_v2, %s2956_s30 }
 0x346   : > { %v1200_v5 = vpop.permute.xlu1 %1199  ;;  %v1279_v46 = vpop.permute.xlu0 %1278 }
 0x347   : > { %2707 = vst.msk [vmem:[%s3300_s22 + $0x94] sm:$0xf] %vm841_vm1, %v1200_v5  ;;  %2730 = vst.msk [vmem:[%s3608_s13 + $0xb0] sm:$0xf] %vm841_vm1, %v1279_v46  ;;  %v1613_v46 = vld [vmem:[%s3300_s22] sm:$0xff] (%p3025_p4)  }
 0x348   : > { %1154 = vrot.lane.b32.xlu1 %v3518_v62, %s2954_s26  ;;  %1526 = vrot.lane.b32.xlu0 %v3466_v48, %s2958_s11  ;;  %1614 = vst [vmem:[%s4145_s17] sm:$0xff] (%p3025_p4), %v1613_v46  }
 0x34a   : > { %v1216_v49 = vpop.permute.xlu1 %1215  ;;  %v1393_v50 = vpop.permute.xlu0 %1392 }
 0x34b   : > { %2715 = vst.msk [vmem:[%s3300_s22 + $0xb4] sm:$0xf] %vm841_vm1, %v1216_v49  ;;  %2754 = vst.msk [vmem:[%s3300_s22 + $0xd0] sm:$0xf] %vm841_vm1, %v1393_v50  ;;  %v1617_v49 = vld [vmem:[%s3300_s22 + $0x8] sm:$0xff] (%p3025_p4)   ;;  %v1621_v50 = vld [vmem:[%s3300_s22 + $0x10] sm:$0xff] (%p3025_p4)  }
 0x34c   : > { %1333 = vrot.lane.b32.xlu1 %v3494_v23, %s2956_s30  ;;  %1542 = vrot.lane.b32.xlu0 %v3499_v2, %s2958_s11  ;;  %1618 = vst [vmem:[%s4145_s17 + $0x8] sm:$0xff] (%p3025_p4), %v1617_v49   ;;  %1622 = vst [vmem:[%s4145_s17 + $0x10] sm:$0xff] (%p3025_p4), %v1621_v50  }
 0x34e   : > { %v1265_v28 = vpop.permute.xlu1 %1264  ;;  %v1409_v29 = vpop.permute.xlu0 %1408 }
 0x34f   : > { %2723 = vst.msk [vmem:[%s3608_s13 + $0x94] sm:$0xf] %vm841_vm1, %v1265_v28  ;;  %2762 = vst.msk [vmem:[%s3300_s22 + $0xf0] sm:$0xf] %vm841_vm1, %v1409_v29  ;;  %v1625_v28 = vld [vmem:[%s3300_s22 + $0x18] sm:$0xff] (%p3025_p4)   ;;  %v1629_v29 = vld [vmem:[%s3300_s22 + $0x20] sm:$0xff] (%p3025_p4)  }
 0x350   : > { %1349 = vrot.lane.b32.xlu1 %v3518_v62, %s2956_s30  ;;  %1626 = vst [vmem:[%s4145_s17 + $0x18] sm:$0xff] (%p3025_p4), %v1625_v28   ;;  %1630 = vst [vmem:[%s4145_s17 + $0x20] sm:$0xff] (%p3025_p4), %v1629_v29  }
 0x352   : > { %v1281_v48 = vpop.permute.xlu1 %1280  ;;  %v1458_v56 = vpop.permute.xlu0 %1457 }
 0x353   : > { %2731 = vst.msk [vmem:[%s3608_s13 + $0xb4] sm:$0xf] %vm841_vm1, %v1281_v48  ;;  %2770 = vst.msk [vmem:[%s3608_s13 + $0xd0] sm:$0xf] %vm841_vm1, %v1458_v56  ;;  %v1633_v48 = vld [vmem:[%s3300_s22 + $0x28] sm:$0xff] (%p3025_p4)   ;;  %v1637_v56 = vld [vmem:[%s3300_s22 + $0x30] sm:$0xff] (%p3025_p4)  }
 0x354   : > { %1528 = vrot.lane.b32.xlu1 %v3494_v23, %s2958_s11  ;;  %1634 = vst [vmem:[%s4145_s17 + $0x28] sm:$0xff] (%p3025_p4), %v1633_v48   ;;  %1638 = vst [vmem:[%s4145_s17 + $0x30] sm:$0xff] (%p3025_p4), %v1637_v56  }
 0x356   : > { %v1395_v2 = vpop.permute.xlu1 %1394  ;;  %v1474_v58 = vpop.permute.xlu0 %1473 }
 0x357   : > { %2755 = vst.msk [vmem:[%s3300_s22 + $0xd4] sm:$0xf] %vm841_vm1, %v1395_v2  ;;  %2778 = vst.msk [vmem:[%s3608_s13 + $0xf0] sm:$0xf] %vm841_vm1, %v1474_v58  ;;  %v1641_v2 = vld [vmem:[%s3300_s22 + $0x38] sm:$0xff] (%p3025_p4)   ;;  %v1645_v58 = vld [vmem:[%s3300_s22 + $0x40] sm:$0xff] (%p3025_p4)  }
 0x358   : > { %1544 = vrot.lane.b32.xlu1 %v3518_v62, %s2958_s11  ;;  %1642 = vst [vmem:[%s4145_s17 + $0x38] sm:$0xff] (%p3025_p4), %v1641_v2   ;;  %1646 = vst [vmem:[%s4145_s17 + $0x80] sm:$0xff] (%p3025_p4), %v1645_v58  }
 0x35a   : > { %v1411_v60 = vpop.permute.xlu1 %1410  ;;  %v1133_v63 = vpop.permute.xlu0 %1132 }
 0x35b   : > { %2763 = vst.msk [vmem:[%s3300_s22 + $0xf4] sm:$0xf] %vm841_vm1, %v1411_v60  ;;  %2690 = vst.msk [vmem:[%s3312_s23 + $0x50] sm:$0xf] %vm841_vm1, %v1133_v63  ;;  %v1649_v60 = vld [vmem:[%s3300_s22 + $0x48] sm:$0xff] (%p3025_p4)   ;;  %v1653_v63 = vld [vmem:[%s3300_s22 + $0x50] sm:$0xff] (%p3025_p4)  }
 0x35c   : > { %1650 = vst [vmem:[%s4145_s17 + $0x88] sm:$0xff] (%p3025_p4), %v1649_v60   ;;  %1654 = vst [vmem:[%s4145_s17 + $0x90] sm:$0xff] (%p3025_p4), %v1653_v63  }
 0x35e   : > { %v1460_v23 = vpop.permute.xlu1 %1459  ;;  %v1149_v17 = vpop.permute.xlu0 %1148 }
 0x35f   : > { %2771 = vst.msk [vmem:[%s3608_s13 + $0xd4] sm:$0xf] %vm841_vm1, %v1460_v23  ;;  %2698 = vst.msk [vmem:[%s3312_s23 + $0x70] sm:$0xf] %vm841_vm1, %v1149_v17  ;;  %v1661_v17 = vld [vmem:[%s3300_s22 + $0x60] sm:$0xff] (%p3025_p4)  }
 0x360   : > { %1662 = vst [vmem:[%s4145_s17 + $0xa0] sm:$0xff] (%p3025_p4), %v1661_v17  }
 0x362   : > { %v1476_v4 = vpop.permute.xlu1 %1475  ;;  %v1328_v44 = vpop.permute.xlu0 %1327 }
 0x363   : > { %2779 = vst.msk [vmem:[%s3608_s13 + $0xf4] sm:$0xf] %vm841_vm1, %v1476_v4  ;;  %2738 = vst.msk [vmem:[%s3312_s23 + $0x90] sm:$0xf] %vm841_vm1, %v1328_v44  ;;  %v1665_v4 = vld [vmem:[%s3300_s22 + $0x68] sm:$0xff] (%p3025_p4)   ;;  %v1669_v44 = vld [vmem:[%s3300_s22 + $0x70] sm:$0xff] (%p3025_p4)  }
 0x364   : > { %1666 = vst [vmem:[%s4145_s17 + $0xa8] sm:$0xff] (%p3025_p4), %v1665_v4   ;;  %1670 = vst [vmem:[%s4145_s17 + $0xb0] sm:$0xff] (%p3025_p4), %v1669_v44  }
 0x366   : > { %v1135_v62 = vpop.permute.xlu1 %1134  ;;  %v1344_v41 = vpop.permute.xlu0 %1343 }
 0x367   : > { %2691 = vst.msk [vmem:[%s3312_s23 + $0x54] sm:$0xf] %vm841_vm1, %v1135_v62  ;;  %2746 = vst.msk [vmem:[%s3312_s23 + $0xb0] sm:$0xf] %vm841_vm1, %v1344_v41  ;;  %v1677_v41 = vld [vmem:[%s3300_s22 + $0x80] sm:$0xff] (%p3025_p4)  }
 0x368   : > { %1678 = vst [vmem:[%s4145_s17 + $0x100] sm:$0xff] (%p3025_p4), %v1677_v41  }
 0x36a   : > { %v1151_v6 = vpop.permute.xlu1 %1150  ;;  %v1523_v26 = vpop.permute.xlu0 %1522 }
 0x36b   : > { %2699 = vst.msk [vmem:[%s3312_s23 + $0x74] sm:$0xf] %vm841_vm1, %v1151_v6  ;;  %2786 = vst.msk [vmem:[%s3312_s23 + $0xd0] sm:$0xf] %vm841_vm1, %v1523_v26  ;;  %v1681_v6 = vld [vmem:[%s3300_s22 + $0x88] sm:$0xff] (%p3025_p4)   ;;  %v1685_v26 = vld [vmem:[%s3300_s22 + $0x90] sm:$0xff] (%p3025_p4)  }
 0x36c   : > { %1682 = vst [vmem:[%s4145_s17 + $0x108] sm:$0xff] (%p3025_p4), %v1681_v6   ;;  %1686 = vst [vmem:[%s4145_s17 + $0x110] sm:$0xff] (%p3025_p4), %v1685_v26  }
 0x36e   : > { %v1330_v52 = vpop.permute.xlu1 %1329  ;;  %v1539_v30 = vpop.permute.xlu0 %1538 }
 0x36f   : > { %2739 = vst.msk [vmem:[%s3312_s23 + $0x94] sm:$0xf] %vm841_vm1, %v1330_v52  ;;  %2794 = vst.msk [vmem:[%s3312_s23 + $0xf0] sm:$0xf] %vm841_vm1, %v1539_v30  ;;  %v1693_v30 = vld [vmem:[%s3300_s22 + $0xa0] sm:$0xff] (%p3025_p4)  }
 0x370   : > { %1694 = vst [vmem:[%s4145_s17 + $0x120] sm:$0xff] (%p3025_p4), %v1693_v30  }
 0x372   : > { %v1346_v18 = vpop.permute.xlu1 %1345  ;;  %v871_v20 = vpop.permute.xlu0 %870 }
 0x373   : > { %2747 = vst.msk [vmem:[%s3312_s23 + $0xb4] sm:$0xf] %vm841_vm1, %v1346_v18  ;;  %912 = vst.msk [vmem:[%s3608_s13 + $0x18] sm:$0xf] %vm841_vm1, %v871_v20  ;;  %v1697_v18 = vld [vmem:[%s3300_s22 + $0xa8] sm:$0xff] (%p3025_p4)   ;;  %v1701_v20 = vld [vmem:[%s3300_s22 + $0xb0] sm:$0xff] (%p3025_p4)  }
 0x374   : > { %1698 = vst [vmem:[%s4145_s17 + $0x128] sm:$0xff] (%p3025_p4), %v1697_v18   ;;  %1702 = vst [vmem:[%s4145_s17 + $0x130] sm:$0xff] (%p3025_p4), %v1701_v20  }
 0x376   : > { %v1525_v42 = vpop.permute.xlu1 %1524  ;;  %v887_v39 = vpop.permute.xlu0 %886 }
 0x377   : > { %2787 = vst.msk [vmem:[%s3312_s23 + $0xd4] sm:$0xf] %vm841_vm1, %v1525_v42  ;;  %920 = vst.msk [vmem:[%s3608_s13 + $0x38] sm:$0xf] %vm841_vm1, %v887_v39  ;;  %v1709_v39 = vld [vmem:[%s3300_s22 + $0xc0] sm:$0xff] (%p3025_p4)  }
 0x378   : > { %1710 = vst [vmem:[%s4145_s17 + $0x180] sm:$0xff] (%p3025_p4), %v1709_v39  }
 0x37a   : > { %v1541_v0 = vpop.permute.xlu1 %1540  ;;  %v1007_v24 = vpop.permute.xlu0 %1006 }
 0x37b   : > { %2795 = vst.msk [vmem:[%s3312_s23 + $0xf4] sm:$0xf] %vm841_vm1, %v1541_v0  ;;  %2660 = vst.msk [vmem:[%s3300_s22 + $0x58] sm:$0xf] %vm841_vm1, %v1007_v24  ;;  %v1713_v0 = vld [vmem:[%s3300_s22 + $0xc8] sm:$0xff] (%p3025_p4)   ;;  %v1717_v24 = vld [vmem:[%s3300_s22 + $0xd0] sm:$0xff] (%p3025_p4)  }
 0x37c   : > { %1714 = vst [vmem:[%s4145_s17 + $0x188] sm:$0xff] (%p3025_p4), %v1713_v0   ;;  %1718 = vst [vmem:[%s4145_s17 + $0x190] sm:$0xff] (%p3025_p4), %v1717_v24  }
 0x37e   : > { %v873_v10 = vpop.permute.xlu1 %872  ;;  %v1023_v57 = vpop.permute.xlu0 %1022 }
 0x37f   : > { %913 = vst.msk [vmem:[%s3608_s13 + $0x1c] sm:$0xf] %vm841_vm1, %v873_v10  ;;  %2668 = vst.msk [vmem:[%s3300_s22 + $0x78] sm:$0xf] %vm841_vm1, %v1023_v57  ;;  %v1725_v57 = vld [vmem:[%s3300_s22 + $0xe0] sm:$0xff] (%p3025_p4)  }
 0x380   : > { %1726 = vst [vmem:[%s4145_s17 + $0x1a0] sm:$0xff] (%p3025_p4), %v1725_v57  }
 0x382   : > { %v889_v47 = vpop.permute.xlu1 %888  ;;  %v1072_v1 = vpop.permute.xlu0 %1071 }
 0x383   : > { %921 = vst.msk [vmem:[%s3608_s13 + $0x3c] sm:$0xf] %vm841_vm1, %v889_v47  ;;  %2676 = vst.msk [vmem:[%s3608_s13 + $0x58] sm:$0xf] %vm841_vm1, %v1072_v1  ;;  %v1729_v47 = vld [vmem:[%s3300_s22 + $0xe8] sm:$0xff] (%p3025_p4)   ;;  %v1733_v1 = vld [vmem:[%s3300_s22 + $0xf0] sm:$0xff] (%p3025_p4)  }
 0x384   : > { %1730 = vst [vmem:[%s4145_s17 + $0x1a8] sm:$0xff] (%p3025_p4), %v1729_v47   ;;  %1734 = vst [vmem:[%s4145_s17 + $0x1b0] sm:$0xff] (%p3025_p4), %v1733_v1  }
 0x386   : > { %v1009_v32 = vpop.permute.xlu1 %1008  ;;  %v1088_v7 = vpop.permute.xlu0 %1087 }
 0x387   : > { %2661 = vst.msk [vmem:[%s3300_s22 + $0x5c] sm:$0xf] %vm841_vm1, %v1009_v32  ;;  %2684 = vst.msk [vmem:[%s3608_s13 + $0x78] sm:$0xf] %vm841_vm1, %v1088_v7 }
 0x38a   : > { %v1025_v54 = vpop.permute.xlu1 %1024  ;;  %v1202_v61 = vpop.permute.xlu0 %1201 }
 0x38b   : > { %2669 = vst.msk [vmem:[%s3300_s22 + $0x7c] sm:$0xf] %vm841_vm1, %v1025_v54  ;;  %2708 = vst.msk [vmem:[%s3300_s22 + $0x98] sm:$0xf] %vm841_vm1, %v1202_v61 }
 0x38e   : > { %v1074_v51 = vpop.permute.xlu1 %1073  ;;  %v1218_v37 = vpop.permute.xlu0 %1217  ;;  %v1657_v23 = vld [vmem:[%s3300_s22 + $0x58] sm:$0xff] (%p3025_p4)  }
 0x38f   : > { %2677 = vst.msk [vmem:[%s3608_s13 + $0x5c] sm:$0xf] %vm841_vm1, %v1074_v51  ;;  %2716 = vst.msk [vmem:[%s3300_s22 + $0xb8] sm:$0xf] %vm841_vm1, %v1218_v37 }
 0x390   : > { %1658 = vst [vmem:[%s4145_s17 + $0x98] sm:$0xff] (%p3025_p4), %v1657_v23  }
 0x392   : > { %v1090_v11 = vpop.permute.xlu1 %1089  ;;  %v1267_v9 = vpop.permute.xlu0 %1266  ;;  %v1673_v62 = vld [vmem:[%s3300_s22 + $0x78] sm:$0xff] (%p3025_p4)  }
 0x393   : > { %2685 = vst.msk [vmem:[%s3608_s13 + $0x7c] sm:$0xf] %vm841_vm1, %v1090_v11  ;;  %2724 = vst.msk [vmem:[%s3608_s13 + $0x98] sm:$0xf] %vm841_vm1, %v1267_v9 }
 0x394   : > { %1674 = vst [vmem:[%s4145_s17 + $0xb8] sm:$0xff] (%p3025_p4), %v1673_v62  }
 0x396   : > { %v1204_v8 = vpop.permute.xlu1 %1203  ;;  %v1283_v21 = vpop.permute.xlu0 %1282 }
 0x397   : > { %2709 = vst.msk [vmem:[%s3300_s22 + $0x9c] sm:$0xf] %vm841_vm1, %v1204_v8  ;;  %2732 = vst.msk [vmem:[%s3608_s13 + $0xb8] sm:$0xf] %vm841_vm1, %v1283_v21 }
 0x39a   : > { %v1220_v12 = vpop.permute.xlu1 %1219  ;;  %v1397_v13 = vpop.permute.xlu0 %1396 }
 0x39b   : > { %2717 = vst.msk [vmem:[%s3300_s22 + $0xbc] sm:$0xf] %vm841_vm1, %v1220_v12  ;;  %2756 = vst.msk [vmem:[%s3300_s22 + $0xd8] sm:$0xf] %vm841_vm1, %v1397_v13 }
 0x39e   : > { %v1269_v25 = vpop.permute.xlu1 %1268  ;;  %v1413_v15 = vpop.permute.xlu0 %1412  ;;  %v1689_v52 = vld [vmem:[%s3300_s22 + $0x98] sm:$0xff] (%p3025_p4)  }
 0x39f   : > { %2725 = vst.msk [vmem:[%s3608_s13 + $0x9c] sm:$0xf] %vm841_vm1, %v1269_v25  ;;  %2764 = vst.msk [vmem:[%s3300_s22 + $0xf8] sm:$0xf] %vm841_vm1, %v1413_v15 }
 0x3a0   : > { %1690 = vst [vmem:[%s4145_s17 + $0x118] sm:$0xff] (%p3025_p4), %v1689_v52  }
 0x3a2   : > { %v1285_v53 = vpop.permute.xlu1 %1284  ;;  %v1462_v19 = vpop.permute.xlu0 %1461  ;;  %v1705_v42 = vld [vmem:[%s3300_s22 + $0xb8] sm:$0xff] (%p3025_p4)  }
 0x3a3   : > { %2733 = vst.msk [vmem:[%s3608_s13 + $0xbc] sm:$0xf] %vm841_vm1, %v1285_v53  ;;  %2772 = vst.msk [vmem:[%s3608_s13 + $0xd8] sm:$0xf] %vm841_vm1, %v1462_v19 }
 0x3a4   : > { %1706 = vst [vmem:[%s4145_s17 + $0x138] sm:$0xff] (%p3025_p4), %v1705_v42  }
 0x3a6   : > { %v1399_v35 = vpop.permute.xlu1 %1398  ;;  %v1478_v22 = vpop.permute.xlu0 %1477 }
 0x3a7   : > { %2757 = vst.msk [vmem:[%s3300_s22 + $0xdc] sm:$0xf] %vm841_vm1, %v1399_v35  ;;  %2780 = vst.msk [vmem:[%s3608_s13 + $0xf8] sm:$0xf] %vm841_vm1, %v1478_v22 }
 0x3aa   : > { %v1415_v3 = vpop.permute.xlu1 %1414  ;;  %v1137_v16 = vpop.permute.xlu0 %1136 }
 0x3ab   : > { %2765 = vst.msk [vmem:[%s3300_s22 + $0xfc] sm:$0xf] %vm841_vm1, %v1415_v3  ;;  %2692 = vst.msk [vmem:[%s3312_s23 + $0x58] sm:$0xf] %vm841_vm1, %v1137_v16 }
 0x3ae   : > { %v1464_v14 = vpop.permute.xlu1 %1463  ;;  %v1153_v45 = vpop.permute.xlu0 %1152  ;;  %v1721_v10 = vld [vmem:[%s3300_s22 + $0xd8] sm:$0xff] (%p3025_p4)  }
 0x3af   : > { %2773 = vst.msk [vmem:[%s3608_s13 + $0xdc] sm:$0xf] %vm841_vm1, %v1464_v14  ;;  %2700 = vst.msk [vmem:[%s3312_s23 + $0x78] sm:$0xf] %vm841_vm1, %v1153_v45 }
 0x3b0   : > { %1722 = vst [vmem:[%s4145_s17 + $0x198] sm:$0xff] (%p3025_p4), %v1721_v10  }
 0x3b2   : > { %v1480_v27 = vpop.permute.xlu1 %1479  ;;  %v1332_v31 = vpop.permute.xlu0 %1331  ;;  %v1737_v32 = vld [vmem:[%s3300_s22 + $0xf8] sm:$0xff] (%p3025_p4)  }
 0x3b3   : > { %2781 = vst.msk [vmem:[%s3608_s13 + $0xfc] sm:$0xf] %vm841_vm1, %v1480_v27  ;;  %2740 = vst.msk [vmem:[%s3312_s23 + $0x98] sm:$0xf] %vm841_vm1, %v1332_v31 }
 0x3b4   : > { %1738 = vst [vmem:[%s4145_s17 + $0x1b8] sm:$0xff] (%p3025_p4), %v1737_v32  }
 0x3b6   : > { %v1139_v33 = vpop.permute.xlu1 %1138  ;;  %v1348_v34 = vpop.permute.xlu0 %1347 }
 0x3b7   : > { %2693 = vst.msk [vmem:[%s3312_s23 + $0x5c] sm:$0xf] %vm841_vm1, %v1139_v33  ;;  %2748 = vst.msk [vmem:[%s3312_s23 + $0xb8] sm:$0xf] %vm841_vm1, %v1348_v34 }
 0x3ba   : > { %v1155_v38 = vpop.permute.xlu1 %1154  ;;  %v1527_v55 = vpop.permute.xlu0 %1526 }
 0x3bb   : > { %2701 = vst.msk [vmem:[%s3312_s23 + $0x7c] sm:$0xf] %vm841_vm1, %v1155_v38  ;;  %2788 = vst.msk [vmem:[%s3312_s23 + $0xd8] sm:$0xf] %vm841_vm1, %v1527_v55 }
 0x3be   : > { %v1334_v59 = vpop.permute.xlu1 %1333  ;;  %v1543_v40 = vpop.permute.xlu0 %1542 }
 0x3bf   : > { %2741 = vst.msk [vmem:[%s3312_s23 + $0x9c] sm:$0xf] %vm841_vm1, %v1334_v59  ;;  %2796 = vst.msk [vmem:[%s3312_s23 + $0xf8] sm:$0xf] %vm841_vm1, %v1543_v40 }
 0x3c2   : > { %v1350_v36 = vpop.permute.xlu1 %1349 }
 0x3c3   : > { %2749 = vst.msk [vmem:[%s3312_s23 + $0xbc] sm:$0xf] %vm841_vm1, %v1350_v36 }
 0x3c6   : > { %v1529_v43 = vpop.permute.xlu1 %1528 }
 0x3c7   : > { %2789 = vst.msk [vmem:[%s3312_s23 + $0xdc] sm:$0xf] %vm841_vm1, %v1529_v43  ;;  %1593 = sbr.rel (!%p3025_p4) target bundleno = 972 (0x3cc), region = 44 }
 0x3ca   : > { %v1545_v5 = vpop.permute.xlu1 %1544 }
 0x3cb   : > { %2797 = vst.msk [vmem:[%s3312_s23 + $0xfc] sm:$0xf] %vm841_vm1, %v1545_v5 }
 0x3cc PF: > { %1892 = sbr.rel (!%p3025_p4) target bundleno = 990 (0x3de), region = 85  ;;  %s2842_s18 = sshll.u32 (%p3025_p4), %s3013_s27, 6  ;;  %v1912_v7 = vld [vmem:[%s3608_s13] sm:$0xff] (%p3025_p4)   ;;  %v1916_v54 = vld [vmem:[%s3608_s13 + $0x8] sm:$0xff] (%p3025_p4)   ;;  %v1920_v61 = vld [vmem:[%s3608_s13 + $0x10] sm:$0xff] (%p3025_p4)  }
 0x3cd   : > { %s4217_s21 = scalar_lea.vmem (%p3025_p4), %s4368_s6, %s2842_s18  ;;  %v1924_v51 = vld [vmem:[%s3608_s13 + $0x18] sm:$0xff] (%p3025_p4)   ;;  %v1928_v37 = vld [vmem:[%s3608_s13 + $0x20] sm:$0xff] (%p3025_p4)   ;;  %v1932_v11 = vld [vmem:[%s3608_s13 + $0x28] sm:$0xff] (%p3025_p4)  }
 0x3ce   : > { %1913 = vst [vmem:[%s4217_s21] sm:$0xff] (%p3025_p4), %v1912_v7   ;;  %1917 = vst [vmem:[%s4217_s21 + $0x8] sm:$0xff] (%p3025_p4), %v1916_v54   ;;  %v1936_v9 = vld [vmem:[%s3608_s13 + $0x30] sm:$0xff] (%p3025_p4)   ;;  %v1940_v8 = vld [vmem:[%s3608_s13 + $0x38] sm:$0xff] (%p3025_p4)  }
 0x3cf   : > { %1921 = vst [vmem:[%s4217_s21 + $0x10] sm:$0xff] (%p3025_p4), %v1920_v61   ;;  %1925 = vst [vmem:[%s4217_s21 + $0x18] sm:$0xff] (%p3025_p4), %v1924_v51   ;;  %v1944_v21 = vld [vmem:[%s3608_s13 + $0x40] sm:$0xff] (%p3025_p4)   ;;  %v1948_v12 = vld [vmem:[%s3608_s13 + $0x48] sm:$0xff] (%p3025_p4)  }
 0x3d0   : > { %1929 = vst [vmem:[%s4217_s21 + $0x20] sm:$0xff] (%p3025_p4), %v1928_v37   ;;  %1933 = vst [vmem:[%s4217_s21 + $0x28] sm:$0xff] (%p3025_p4), %v1932_v11   ;;  %v1952_v13 = vld [vmem:[%s3608_s13 + $0x50] sm:$0xff] (%p3025_p4)   ;;  %v1956_v25 = vld [vmem:[%s3608_s13 + $0x58] sm:$0xff] (%p3025_p4)  }
 0x3d1   : > { %1937 = vst [vmem:[%s4217_s21 + $0x30] sm:$0xff] %v1936_v9   ;;  %1941 = vst [vmem:[%s4217_s21 + $0x38] sm:$0xff] %v1940_v8   ;;  %v1960_v15 = vld [vmem:[%s3608_s13 + $0x60] sm:$0xff]   ;;  %v1964_v53 = vld [vmem:[%s3608_s13 + $0x68] sm:$0xff]  }
 0x3d2   : > { %1945 = vst [vmem:[%s4217_s21 + $0x80] sm:$0xff] %v1944_v21   ;;  %1949 = vst [vmem:[%s4217_s21 + $0x88] sm:$0xff] %v1948_v12   ;;  %v1968_v19 = vld [vmem:[%s3608_s13 + $0x70] sm:$0xff]   ;;  %v1972_v35 = vld [vmem:[%s3608_s13 + $0x78] sm:$0xff]  }
 0x3d3   : > { %1953 = vst [vmem:[%s4217_s21 + $0x90] sm:$0xff] %v1952_v13   ;;  %1957 = vst [vmem:[%s4217_s21 + $0x98] sm:$0xff] %v1956_v25   ;;  %v1976_v22 = vld [vmem:[%s3608_s13 + $0x80] sm:$0xff]   ;;  %v1980_v3 = vld [vmem:[%s3608_s13 + $0x88] sm:$0xff]  }
 0x3d4   : > { %1961 = vst [vmem:[%s4217_s21 + $0xa0] sm:$0xff] %v1960_v15   ;;  %1965 = vst [vmem:[%s4217_s21 + $0xa8] sm:$0xff] %v1964_v53   ;;  %v1984_v16 = vld [vmem:[%s3608_s13 + $0x90] sm:$0xff]   ;;  %v1988_v14 = vld [vmem:[%s3608_s13 + $0x98] sm:$0xff]  }
 0x3d5   : > { %1969 = vst [vmem:[%s4217_s21 + $0xb0] sm:$0xff] %v1968_v19   ;;  %1973 = vst [vmem:[%s4217_s21 + $0xb8] sm:$0xff] %v1972_v35   ;;  %v1992_v45 = vld [vmem:[%s3608_s13 + $0xa0] sm:$0xff]   ;;  %v1996_v27 = vld [vmem:[%s3608_s13 + $0xa8] sm:$0xff]  }
 0x3d6   : > { %1977 = vst [vmem:[%s4217_s21 + $0x100] sm:$0xff] %v1976_v22   ;;  %1981 = vst [vmem:[%s4217_s21 + $0x108] sm:$0xff] %v1980_v3   ;;  %v2000_v31 = vld [vmem:[%s3608_s13 + $0xb0] sm:$0xff]   ;;  %v2004_v33 = vld [vmem:[%s3608_s13 + $0xb8] sm:$0xff]  }
 0x3d7   : > { %1985 = vst [vmem:[%s4217_s21 + $0x110] sm:$0xff] %v1984_v16   ;;  %1989 = vst [vmem:[%s4217_s21 + $0x118] sm:$0xff] %v1988_v14   ;;  %v2008_v34 = vld [vmem:[%s3608_s13 + $0xc0] sm:$0xff]   ;;  %v2012_v38 = vld [vmem:[%s3608_s13 + $0xc8] sm:$0xff]  }
 0x3d8   : > { %1993 = vst [vmem:[%s4217_s21 + $0x120] sm:$0xff] %v1992_v45   ;;  %1997 = vst [vmem:[%s4217_s21 + $0x128] sm:$0xff] %v1996_v27   ;;  %v2016_v55 = vld [vmem:[%s3608_s13 + $0xd0] sm:$0xff]   ;;  %v2020_v59 = vld [vmem:[%s3608_s13 + $0xd8] sm:$0xff]  }
 0x3d9   : > { %2001 = vst [vmem:[%s4217_s21 + $0x130] sm:$0xff] %v2000_v31   ;;  %2005 = vst [vmem:[%s4217_s21 + $0x138] sm:$0xff] %v2004_v33   ;;  %v2024_v40 = vld [vmem:[%s3608_s13 + $0xe0] sm:$0xff]   ;;  %v2028_v36 = vld [vmem:[%s3608_s13 + $0xe8] sm:$0xff]  }
 0x3da   : > { %2009 = vst [vmem:[%s4217_s21 + $0x180] sm:$0xff] %v2008_v34   ;;  %2013 = vst [vmem:[%s4217_s21 + $0x188] sm:$0xff] %v2012_v38   ;;  %v2032_v43 = vld [vmem:[%s3608_s13 + $0xf0] sm:$0xff]   ;;  %v2036_v5 = vld [vmem:[%s3608_s13 + $0xf8] sm:$0xff]  }
 0x3db   : > { %2017 = vst [vmem:[%s4217_s21 + $0x190] sm:$0xff] %v2016_v55   ;;  %2021 = vst [vmem:[%s4217_s21 + $0x198] sm:$0xff] %v2020_v59  }
 0x3dc   : > { %2025 = vst [vmem:[%s4217_s21 + $0x1a0] sm:$0xff] %v2024_v40   ;;  %2029 = vst [vmem:[%s4217_s21 + $0x1a8] sm:$0xff] %v2028_v36  }
 0x3dd   : > { %2033 = vst [vmem:[%s4217_s21 + $0x1b0] sm:$0xff] %v2032_v43   ;;  %2037 = vst [vmem:[%s4217_s21 + $0x1b8] sm:$0xff] %v2036_v5  }
 0x3de PF: > { %2191 = sbr.rel (!%p3025_p4) target bundleno = 1008 (0x3f0), region = 126  ;;  %s2843_s22 = sshll.u32 (%p3025_p4), %s3013_s27, 6  ;;  %v2211_v46 = vld [vmem:[%s3312_s23] sm:$0xff] (%p3025_p4)   ;;  %v2215_v49 = vld [vmem:[%s3312_s23 + $0x8] sm:$0xff] (%p3025_p4)   ;;  %v2219_v50 = vld [vmem:[%s3312_s23 + $0x10] sm:$0xff] (%p3025_p4)  }
 0x3df   : > { %s4289_s29 = scalar_lea.vmem (%p3025_p4), %s4369_s7, %s2843_s22  ;;  %v2223_v28 = vld [vmem:[%s3312_s23 + $0x18] sm:$0xff] (%p3025_p4)   ;;  %v2227_v29 = vld [vmem:[%s3312_s23 + $0x20] sm:$0xff] (%p3025_p4)   ;;  %v2231_v48 = vld [vmem:[%s3312_s23 + $0x28] sm:$0xff] (%p3025_p4)  }
 0x3e0   : > { %2212 = vst [vmem:[%s4289_s29] sm:$0xff] (%p3025_p4), %v2211_v46   ;;  %2216 = vst [vmem:[%s4289_s29 + $0x8] sm:$0xff] (%p3025_p4), %v2215_v49   ;;  %v2235_v56 = vld [vmem:[%s3312_s23 + $0x30] sm:$0xff] (%p3025_p4)   ;;  %v2239_v2 = vld [vmem:[%s3312_s23 + $0x38] sm:$0xff] (%p3025_p4)  }
 0x3e1   : > { %2220 = vst [vmem:[%s4289_s29 + $0x10] sm:$0xff] (%p3025_p4), %v2219_v50   ;;  %2224 = vst [vmem:[%s4289_s29 + $0x18] sm:$0xff] (%p3025_p4), %v2223_v28   ;;  %v2243_v58 = vld [vmem:[%s3312_s23 + $0x40] sm:$0xff] (%p3025_p4)   ;;  %v2247_v60 = vld [vmem:[%s3312_s23 + $0x48] sm:$0xff] (%p3025_p4)  }
 0x3e2   : > { %2228 = vst [vmem:[%s4289_s29 + $0x20] sm:$0xff] (%p3025_p4), %v2227_v29   ;;  %2232 = vst [vmem:[%s4289_s29 + $0x28] sm:$0xff] (%p3025_p4), %v2231_v48   ;;  %v2251_v63 = vld [vmem:[%s3312_s23 + $0x50] sm:$0xff] (%p3025_p4)   ;;  %v2255_v23 = vld [vmem:[%s3312_s23 + $0x58] sm:$0xff] (%p3025_p4)  }
 0x3e3   : > { %2236 = vst [vmem:[%s4289_s29 + $0x30] sm:$0xff] %v2235_v56   ;;  %2240 = vst [vmem:[%s4289_s29 + $0x38] sm:$0xff] %v2239_v2   ;;  %v2259_v17 = vld [vmem:[%s3312_s23 + $0x60] sm:$0xff]   ;;  %v2263_v4 = vld [vmem:[%s3312_s23 + $0x68] sm:$0xff]  }
 0x3e4   : > { %2244 = vst [vmem:[%s4289_s29 + $0x80] sm:$0xff] %v2243_v58   ;;  %2248 = vst [vmem:[%s4289_s29 + $0x88] sm:$0xff] %v2247_v60   ;;  %v2267_v44 = vld [vmem:[%s3312_s23 + $0x70] sm:$0xff]   ;;  %v2271_v62 = vld [vmem:[%s3312_s23 + $0x78] sm:$0xff]  }
 0x3e5   : > { %2252 = vst [vmem:[%s4289_s29 + $0x90] sm:$0xff] %v2251_v63   ;;  %2256 = vst [vmem:[%s4289_s29 + $0x98] sm:$0xff] %v2255_v23   ;;  %v2275_v41 = vld [vmem:[%s3312_s23 + $0x80] sm:$0xff]   ;;  %v2279_v6 = vld [vmem:[%s3312_s23 + $0x88] sm:$0xff]  }
 0x3e6   : > { %2260 = vst [vmem:[%s4289_s29 + $0xa0] sm:$0xff] %v2259_v17   ;;  %2264 = vst [vmem:[%s4289_s29 + $0xa8] sm:$0xff] %v2263_v4   ;;  %v2283_v26 = vld [vmem:[%s3312_s23 + $0x90] sm:$0xff]   ;;  %v2287_v52 = vld [vmem:[%s3312_s23 + $0x98] sm:$0xff]  }
 0x3e7   : > { %2268 = vst [vmem:[%s4289_s29 + $0xb0] sm:$0xff] %v2267_v44   ;;  %2272 = vst [vmem:[%s4289_s29 + $0xb8] sm:$0xff] %v2271_v62   ;;  %v2291_v30 = vld [vmem:[%s3312_s23 + $0xa0] sm:$0xff]   ;;  %v2295_v18 = vld [vmem:[%s3312_s23 + $0xa8] sm:$0xff]  }
 0x3e8   : > { %2276 = vst [vmem:[%s4289_s29 + $0x100] sm:$0xff] %v2275_v41   ;;  %2280 = vst [vmem:[%s4289_s29 + $0x108] sm:$0xff] %v2279_v6   ;;  %v2299_v20 = vld [vmem:[%s3312_s23 + $0xb0] sm:$0xff]   ;;  %v2303_v42 = vld [vmem:[%s3312_s23 + $0xb8] sm:$0xff]  }
 0x3e9   : > { %2284 = vst [vmem:[%s4289_s29 + $0x110] sm:$0xff] %v2283_v26   ;;  %2288 = vst [vmem:[%s4289_s29 + $0x118] sm:$0xff] %v2287_v52   ;;  %v2307_v39 = vld [vmem:[%s3312_s23 + $0xc0] sm:$0xff]   ;;  %v2311_v0 = vld [vmem:[%s3312_s23 + $0xc8] sm:$0xff]  }
 0x3ea   : > { %2292 = vst [vmem:[%s4289_s29 + $0x120] sm:$0xff] %v2291_v30   ;;  %2296 = vst [vmem:[%s4289_s29 + $0x128] sm:$0xff] %v2295_v18   ;;  %v2315_v24 = vld [vmem:[%s3312_s23 + $0xd0] sm:$0xff]   ;;  %v2319_v10 = vld [vmem:[%s3312_s23 + $0xd8] sm:$0xff]  }
 0x3eb   : > { %2300 = vst [vmem:[%s4289_s29 + $0x130] sm:$0xff] %v2299_v20   ;;  %2304 = vst [vmem:[%s4289_s29 + $0x138] sm:$0xff] %v2303_v42   ;;  %v2323_v57 = vld [vmem:[%s3312_s23 + $0xe0] sm:$0xff]   ;;  %v2327_v47 = vld [vmem:[%s3312_s23 + $0xe8] sm:$0xff]  }
 0x3ec   : > { %2308 = vst [vmem:[%s4289_s29 + $0x180] sm:$0xff] %v2307_v39   ;;  %2312 = vst [vmem:[%s4289_s29 + $0x188] sm:$0xff] %v2311_v0   ;;  %v2331_v1 = vld [vmem:[%s3312_s23 + $0xf0] sm:$0xff]   ;;  %v2335_v32 = vld [vmem:[%s3312_s23 + $0xf8] sm:$0xff]  }
 0x3ed   : > { %2316 = vst [vmem:[%s4289_s29 + $0x190] sm:$0xff] %v2315_v24   ;;  %2320 = vst [vmem:[%s4289_s29 + $0x198] sm:$0xff] %v2319_v10  }
 0x3ee   : > { %2324 = vst [vmem:[%s4289_s29 + $0x1a0] sm:$0xff] %v2323_v57   ;;  %2328 = vst [vmem:[%s4289_s29 + $0x1a8] sm:$0xff] %v2327_v47  }
 0x3ef   : > { %2332 = vst [vmem:[%s4289_s29 + $0x1b0] sm:$0xff] %v2331_v1   ;;  %2336 = vst [vmem:[%s4289_s29 + $0x1b8] sm:$0xff] %v2335_v32  }
 0x3f0 PF: > { %p15_p8 = scmp.ge.s32.totalorder %s3015_s28, 4   ;;  %s4371_s24 = smov %s2946_s25 }
 0x3f1   : > { %s4372_s25 = smov %s3023_s8  ;;  %s4373_s26 = smov %s3015_s28 }
 0x3f2   :  { %17 = sbr.rel (!%p15_p8) target bundleno = 2 (0x2), region = 226 }

</bundles_post_ra>
